<compile_context>
chip_gen: v7x
topology: tpu7x:2x2x1
jax: 0.10.0
libtpu: 0.0.40
codegen_flags: <defaults>
</compile_context>

<pallas_src>
import functools

import jax
import jax.numpy as jnp
from jax import lax
from jax.experimental import pallas as pl
from jax.experimental.pallas import tpu as pltpu


def _round_up(a: int, b: int) -> int:
    return (a + b - 1) // b * b


def _vmem_budget_bytes() -> int:
    """Per-core VMEM budget (bytes) for the kernel's working set."""
    phys = 64 * 1024 * 1024  # conservative default: v7x per-TensorCore VMEM
    try:
        phys = int(pltpu.get_tpu_info().vmem_capacity_bytes)
    except Exception:
        pass
    # Leave headroom for Mosaic internal scratch; never below 32 MiB, never
    # above 100 MiB (plenty on 128 MiB parts, safe everywhere).
    return max(32 * 1024 * 1024, min(phys * 3 // 4, 100 * 1024 * 1024))


def graph_mix_kernel(x_ref, w_ref, b_ref, adj_ref, o_ref, acc_ref, *, compute_dtype):
    """One (i, k) grid step.

    x_ref:   (tk, d_in)        input dtype      -- rows k*tk : (k+1)*tk of x
    w_ref:   (d_out_pad, d_in) input dtype      -- PyTorch layout, zero-padded
    b_ref:   (1, d_out_pad)    f32
    adj_ref: (tm, tk)          input dtype      -- adj tile (i, k), streamed as-is
    o_ref:   (tm, d_out_pad)   out dtype        -- output rows i*tm : (i+1)*tm
    acc_ref: (tm, d_out_pad)   f32 scratch accumulator (resident across k)
    """
    k = pl.program_id(1)

    @pl.when(k == 0)
    def _():
        acc_ref[...] = jnp.zeros_like(acc_ref)

    # h_k = x_k @ W^T + b   (contract dim 1 of x with dim 1 of W; f32 accumulate).
    h = lax.dot_general(
        x_ref[...], w_ref[...],
        dimension_numbers=(((1,), (1,)), ((), ())),
        preferred_element_type=jnp.float32,
    )
    h = (h + b_ref[...]).astype(compute_dtype)          # (tk, d_out_pad)

    # In-kernel VPU cast of the adj tile (no extra HBM pass in the wrapper),
    # then the big MXU matmul, accumulated in f32.
    a = adj_ref[...].astype(compute_dtype)               # (tm, tk)
    acc_ref[...] += jnp.dot(a, h, preferred_element_type=jnp.float32)

    @pl.when(k == pl.num_programs(1) - 1)
    def _():
        o_ref[...] = jnp.maximum(acc_ref[...], 0.0).astype(o_ref.dtype)


@functools.partial(jax.jit, static_argnames=("max_tile", "compute_dtype", "out_dtype"))
def graph_mix_layer(x, weight, bias, adj, *, max_tile=2048,
                    compute_dtype=jnp.bfloat16, out_dtype=jnp.float32):
    """x: (N, D_in), weight: (D_out, D_in) [PyTorch layout], bias: (D_out,),
    adj: (N, N).  Returns relu(adj @ (x @ W^T + b)) as (N, D_out)."""
    n, d_in = x.shape
    d_out = weight.shape[0]

    adj_isize = jnp.dtype(adj.dtype).itemsize
    x_isize = jnp.dtype(x.dtype).itemsize
    out_isize = jnp.dtype(out_dtype).itemsize
    c_isize = jnp.dtype(compute_dtype).itemsize

    n128 = _round_up(n, 128)
    d_out_pad = _round_up(d_out, 128)

    # --- VMEM working-set model for an (tm, tk) tile --------------------------
    def vmem_need(tm, tk):
        b = 2 * tm * tk * adj_isize                         # adj double buffer
        if adj_isize != c_isize:
            b += tm * tk * c_isize                          # in-kernel cast temp
        b += 2 * tk * d_in * x_isize                        # x double buffer
        b += 2 * d_out_pad * d_in * x_isize + 2 * d_out_pad * 4   # W + bias
        b += tm * d_out_pad * 4                             # f32 accumulator
        b += 2 * tm * d_out_pad * out_isize                 # out double buffer
        b += tk * d_out_pad * c_isize                       # h temp
        return b + (1 << 21)                                # 2 MiB slack

    vmem_budget = _vmem_budget_bytes()
    max_tile = max(128, int(max_tile))
    cands = [t for t in (2048, 1024, 512, 256, 128) if t <= max_tile] or [128]
    t_cap = 128
    for t in cands:
        if vmem_need(t, t) <= vmem_budget:
            t_cap = t
            break

    # --- tile selection: never force a pad copy just to make the grid divide --
    n_pad = n128
    if n128 <= t_cap:
        tm = tk = n128                       # whole (padded-to-128) matrix in one tile
    else:
        tm = tk = 128
        for m in range(min(t_cap, n128) // 128, 0, -1):
            if n128 % (m * 128) == 0:        # largest 128-multiple divisor of n128
                tm = tk = m * 128
                break
    # Megacore (v7x): keep >= 2 row tiles when the whole matrix fits one tile.
    if tm == n_pad and n_pad >= 1024 and n_pad % 256 == 0:
        tm = n_pad // 2

    grid = (n_pad // tm, n_pad // tk)

    # --- inputs: only copy when padding is actually required ------------------
    if n_pad != n:
        adj_in = jnp.pad(adj, ((0, n_pad - n), (0, n_pad - n)))
        x_in = jnp.pad(x, ((0, n_pad - n), (0, 0)))
    else:
        adj_in = adj                          # streamed as-is: no extra HBM pass
        x_in = x
    if d_out_pad != d_out:
        w_in = jnp.pad(weight, ((0, d_out_pad - d_out), (0, 0)))
        b_in = jnp.pad(bias, (0, d_out_pad - d_out))
    else:
        w_in = weight
        b_in = bias
    b_in = b_in.reshape(1, d_out_pad).astype(jnp.float32)

    # --- cost hint for the XLA scheduler ---------------------------------------
    flops = (2 * n_pad * n_pad * d_out_pad                        # adj @ h
             + 2 * n_pad * d_in * d_out_pad * grid[0])            # linear per row tile
    bytes_accessed = (n_pad * n_pad * adj_isize
                      + n_pad * d_in * x_isize * grid[0]
                      + d_out_pad * d_in * x_isize + d_out_pad * 4
                      + n_pad * d_out_pad * out_isize)
    cost = pl.CostEstimate(flops=flops, transcendentals=0,
                           bytes_accessed=bytes_accessed)

    out_p = pl.pallas_call(
        functools.partial(graph_mix_kernel, compute_dtype=compute_dtype),
        out_shape=jax.ShapeDtypeStruct((n_pad, d_out_pad), out_dtype),
        grid_spec=pltpu.PrefetchScalarGridSpec(
            num_scalar_prefetch=0,
            grid=grid,
            in_specs=[
                pl.BlockSpec((tk, d_in), lambda i, k: (k, 0)),          # x rows k
                pl.BlockSpec((d_out_pad, d_in), lambda i, k: (0, 0)),   # W (resident)
                pl.BlockSpec((1, d_out_pad), lambda i, k: (0, 0)),      # bias (resident)
                pl.BlockSpec((tm, tk), lambda i, k: (i, k)),            # adj tile
            ],
            out_specs=pl.BlockSpec((tm, d_out_pad), lambda i, k: (i, 0)),
            scratch_shapes=[pltpu.VMEM((tm, d_out_pad), jnp.float32)],
        ),
        compiler_params=pltpu.CompilerParams(
            dimension_semantics=("parallel", "arbitrary"),
            vmem_limit_bytes=int(vmem_budget),
        ),
        cost_estimate=cost,
    )(x_in, w_in, b_in, adj_in)

    if n_pad != n or d_out_pad != d_out:
        return out_p[:n, :d_out]
    return out_p


if __name__ == "__main__":
    input_dim, output_dim = 32, 16

    key = jax.random.PRNGKey(0)
    kx, ka, kw, kb = jax.random.split(key, 4)

    # Deterministic params (mimics nn.Linear's uniform(-1/sqrt(in), 1/sqrt(in))).
    bound = 1.0 / (input_dim ** 0.5)
    weight = jax.random.uniform(
        kw, (output_dim, input_dim), minval=-bound, maxval=bound, dtype=jnp.float32)
    bias = jax.random.uniform(
        kb, (output_dim,), minval=-bound, maxval=bound, dtype=jnp.float32)

    def reference(x, adj):
        # Mirrors the kernel's numerics: f32 Linear, h and adj rounded to bf16
        # for the MXU matmul, f32 accumulation, relu.
        h = x @ weight.T + bias
        h = h.astype(jnp.bfloat16).astype(jnp.float32)
        a = adj.astype(jnp.bfloat16).astype(jnp.float32)
        return jnp.maximum(a @ h, 0.0)

    cases = [
        (384, {}),                    # 128-aligned: zero wrapper copies, single tile
        (300, {}),                    # unaligned N: padded path
        (384, {"max_tile": 128}),     # forced 3x3 grid: exercises k-accumulation
    ]
    for n, kwargs in cases:
        kxn, kan = jax.random.split(jax.random.fold_in(kx, n))
        x = jax.random.normal(kxn, (n, input_dim), dtype=jnp.float32)
        adj = jax.random.uniform(kan, (n, n), dtype=jnp.float32)

        out = graph_mix_layer(x, weight, bias, adj, **kwargs)
        out = jax.block_until_ready(out)
        ref = reference(x, adj)

        assert out.shape == (n, output_dim)
        assert jnp.allclose(out, ref, atol=2e-2, rtol=2e-2), \
            f"mismatch vs reference (n={n}, kwargs={kwargs})"

    print("KERNEL_OK")
</pallas_src>

<mosaic_0001>
module attributes {stable_mosaic.version = 11 : i64} {
  func.func @graph_mix_kernel(%arg0: i32, %arg1: i32, %arg2: memref<384x32xf32, #tpu.memory_space<vmem>>, %arg3: memref<128x32xf32, #tpu.memory_space<vmem>>, %arg4: memref<1x128xf32, #tpu.memory_space<vmem>>, %arg5: memref<384x384xf32, #tpu.memory_space<vmem>>, %arg6: memref<384x128xf32, #tpu.memory_space<vmem>>, %arg7: memref<384x128xf32, #tpu.memory_space<vmem>>) attributes {dimension_semantics = [#tpu.dimension_semantics<parallel>, #tpu.dimension_semantics<arbitrary>], iteration_bounds = array<i64: 1, 1>, scalar_prefetch = 0 : i64, scratch_operands = 1 : i64, tpu.core_type = #tpu.core_type<tc>, window_params = [{transform_indices = @transform_0, window_bounds = array<i64: 384, 32>}, {pipeline_mode = #tpu.pipeline_mode<synchronous>, transform_indices = @transform_1, window_bounds = array<i64: 128, 32>}, {pipeline_mode = #tpu.pipeline_mode<synchronous>, transform_indices = @transform_2, window_bounds = array<i64: 1, 128>}, {transform_indices = @transform_3, window_bounds = array<i64: 384, 384>}, {transform_indices = @transform_4, window_bounds = array<i64: 384, 128>}]} {
    %c0_i32 = arith.constant 0 : i32
    %0 = arith.cmpi eq, %arg1, %c0_i32 : i32
    %1 = arith.extui %0 : i1 to i32
    %c0_i32_0 = arith.constant 0 : i32
    %2 = arith.cmpi ne, %1, %c0_i32_0 : i32
    scf.if %2 {
      %cst_15 = arith.constant 0.000000e+00 : f32
      %19 = vector.broadcast %cst_15 : f32 to vector<384x128xf32>
      %c0_16 = arith.constant 0 : index
      %c0_17 = arith.constant 0 : index
      %20 = vector.load %arg7[%c0_16, %c0_17] : memref<384x128xf32, #tpu.memory_space<vmem>>, vector<384x128xf32>
      tpu.vector_store %arg7[%c0_16, %c0_17], %19 {strides = array<i32>} : memref<384x128xf32, #tpu.memory_space<vmem>>, vector<384x128xf32>,
    } else {
    }
    %c0 = arith.constant 0 : index
    %c0_1 = arith.constant 0 : index
    %3 = vector.load %arg2[%c0, %c0_1] : memref<384x32xf32, #tpu.memory_space<vmem>>, vector<384x32xf32>
    %c0_2 = arith.constant 0 : index
    %c0_3 = arith.constant 0 : index
    %4 = vector.load %arg3[%c0_2, %c0_3] : memref<128x32xf32, #tpu.memory_space<vmem>>, vector<128x32xf32>
    %cst = arith.constant dense<0.000000e+00> : vector<384x128xf32>
    %5 = tpu.matmul %3, %4, %cst {dimension_numbers = #tpu.dot_dimension_numbers<[1], [1], [0], [0], [0, 0, 1, 0], [], []>} : vector<384x32xf32>, vector<128x32xf32>, vector<384x128xf32> -> vector<384x128xf32>
    %c0_4 = arith.constant 0 : index
    %c0_5 = arith.constant 0 : index
    %6 = vector.load %arg4[%c0_4, %c0_5] : memref<1x128xf32, #tpu.memory_space<vmem>>, vector<1x128xf32>
    %7 = vector.broadcast %6 : vector<1x128xf32> to vector<384x128xf32>
    %8 = arith.addf %5, %7 : vector<384x128xf32>
    %9 = arith.truncf %8 : vector<384x128xf32> to vector<384x128xbf16>
    %c0_6 = arith.constant 0 : index
    %c0_7 = arith.constant 0 : index
    %10 = vector.load %arg5[%c0_6, %c0_7] : memref<384x384xf32, #tpu.memory_space<vmem>>, vector<384x384xf32>
    %11 = arith.truncf %10 : vector<384x384xf32> to vector<384x384xbf16>
    %c0_8 = arith.constant 0 : index
    %c0_9 = arith.constant 0 : index
    %12 = vector.load %arg7[%c0_8, %c0_9] : memref<384x128xf32, #tpu.memory_space<vmem>>, vector<384x128xf32>
    %cst_10 = arith.constant dense<0.000000e+00> : vector<384x128xf32>
    %13 = tpu.matmul %11, %9, %cst_10 {dimension_numbers = #tpu.dot_dimension_numbers<[1], [0], [0], [1], [0, 0, 1, 1], [], []>} : vector<384x384xbf16>, vector<384x128xbf16>, vector<384x128xf32> -> vector<384x128xf32>
    %14 = arith.addf %12, %13 : vector<384x128xf32>
    %c0_11 = arith.constant 0 : index
    %c0_12 = arith.constant 0 : index
    %15 = vector.load %arg7[%c0_11, %c0_12] : memref<384x128xf32, #tpu.memory_space<vmem>>, vector<384x128xf32>
    tpu.vector_store %arg7[%c0_11, %c0_12], %14 {strides = array<i32>} : memref<384x128xf32, #tpu.memory_space<vmem>>, vector<384x128xf32>,
    %c0_i32_13 = arith.constant 0 : i32
    %16 = arith.cmpi eq, %arg1, %c0_i32_13 : i32
    %17 = arith.extui %16 : i1 to i32
    %c0_i32_14 = arith.constant 0 : i32
    %18 = arith.cmpi ne, %17, %c0_i32_14 : i32
    scf.if %18 {
      %c0_15 = arith.constant 0 : index
      %c0_16 = arith.constant 0 : index
      %19 = vector.load %arg7[%c0_15, %c0_16] : memref<384x128xf32, #tpu.memory_space<vmem>>, vector<384x128xf32>
      %cst_17 = arith.constant 0.000000e+00 : f32
      %20 = vector.broadcast %cst_17 : f32 to vector<384x128xf32>
      %21 = arith.maximumf %19, %20 : vector<384x128xf32>
      %c0_18 = arith.constant 0 : index
      %c0_19 = arith.constant 0 : index
      %22 = vector.load %arg6[%c0_18, %c0_19] : memref<384x128xf32, #tpu.memory_space<vmem>>, vector<384x128xf32>
      tpu.vector_store %arg6[%c0_18, %c0_19], %21 {strides = array<i32>} : memref<384x128xf32, #tpu.memory_space<vmem>>, vector<384x128xf32>,
    } else {
    }
    return
  }
  func.func @transform_0(%arg0: i32, %arg1: i32) -> (i32, i32) {
    %c0_i32 = arith.constant 0 : i32
    %c0_i32_0 = arith.constant 0 : i32
    return %arg1, %c0_i32 : i32, i32
  }
  func.func @transform_1(%arg0: i32, %arg1: i32) -> (i32, i32) {
    %c0_i32 = arith.constant 0 : i32
    %c0_i32_0 = arith.constant 0 : i32
    %c0_i32_1 = arith.constant 0 : i32
    return %c0_i32, %c0_i32_0 : i32, i32
  }
  func.func @transform_2(%arg0: i32, %arg1: i32) -> (i32, i32) {
    %c0_i32 = arith.constant 0 : i32
    %c0_i32_0 = arith.constant 0 : i32
    %c0_i32_1 = arith.constant 0 : i32
    return %c0_i32, %c0_i32_0 : i32, i32
  }
  func.func @transform_3(%arg0: i32, %arg1: i32) -> (i32, i32) {
    %c0_i32 = arith.constant 0 : i32
    return %arg0, %arg1 : i32, i32
  }
  func.func @transform_4(%arg0: i32, %arg1: i32) -> (i32, i32) {
    %c0_i32 = arith.constant 0 : i32
    %c0_i32_0 = arith.constant 0 : i32
    return %arg0, %c0_i32 : i32, i32
  }
}

</mosaic_0001>

<bundles_post_ra>
// kernel: graph_mix_layer.1
= control target key start
LH: loop header
LB: loop body
LE: loop exit
PB: predicated region body
PF: predicated region fallthrough
CT: control target
= control target key end

     0   :  { %9 = vsyncpa [#allocation4], 0  ;;  %s2044_s15 = smov [#allocation3]   ;;  %s2609_s0 = inlined_call_operand.vmem [shape: f32[384,32], index: 0, kind: input, shape index: {}]   ;;  %s2610_s1 = inlined_call_operand.vmem [shape: f32[128,32], index: 1, kind: input, shape index: {}]   ;;  %s2611_s2 = inlined_call_operand.vmem [shape: f32[1,128], index: 2, kind: input, shape index: {}]   ;;  %s2612_s3 = inlined_call_operand.hbm [shape: f32[384,384], index: 3, kind: input, shape index: {}]   ;;  %s2613_s4 = inlined_call_operand.vmem [shape: f32[384,128], index: 4, kind: output, shape index: {}]  }
   0x1   :  { %s21_s16 = sshll.u32 %s2044_s15, 4  ;;  %s2020_s19 = scalar_lea.hbm %s2612_s3, 18432  ;;  %s22_s16 = int_to_ptr.vmem [resolvable:$true] %s21_s16 }
   0x2   :  { %p2021_p0 = scmp.ne.s32.totalorder %s2612_s3, %s2020_s19  ;;  %p2024_p1 = scmp.lt.u32.totalorder %s2020_s19, %s2612_s3 }
   0x4   :  { %p2026_p2 = pnand %p2024_p1, %p2021_p0 }
   0x6   :  { %2029 = shalt.err (!%p2026_p2)
}
   0x7   :  { %s2030_s24 = scalar_lea.vmem %s22_s16, 18432  ;;  %p2035_p4 = scmp.lt.s32.totalorder %s22_s16, %s22_s16 }
   0x8   :  { %p2031_p3 = scmp.ne.s32.totalorder %s22_s16, %s2030_s24  ;;  %p2036_p5 = scmp.lt.s32.totalorder %s2030_s24, %s2030_s24 }
   0xa   :  { %p2037_p6 = por %p2036_p5, %p2035_p4 }
   0xc   :  { %p2038_p7 = pnand %p2037_p6, %p2031_p3 }
   0xe   :  { %2041 = shalt.err (!%p2038_p7)
}
   0xf   :  { %s2045_s25 = smov 384   ;;  %s2046_s26 = smov 24  }
  0x10   :  { %27 = dma.hbm_to_vmem [thread:$0]  %s2612_s3, 18432, %s22_s16, [#allocation4], %s2045_s25, %s2045_s25, %s2046_s26  }
  0x11   :  { %2042 = dma.done.wait [#allocation4], 18432  }
  0x12   :  { %2043 = vsyncadd [#allocation4], 4294948864  ;;  %vm155_vm0 = vcmask 261120   ;;  %v132_v1 = vld [vmem:[%s2610_s1] sm:$0xff]  ;;  %v133_v2 = vld [vmem:[%s2610_s1 + $0x8] sm:$0xff] }
  0x13   :  { %vm2087_vm1 = vmpackc.low %vm155_vm0, %vm155_vm0  ;;  %v134_v3 = vld [vmem:[%s2610_s1 + $0x10] sm:$0xff]  ;;  %v1968_v4 = vpack.c.bf16 %v133_v2, %v132_v1  ;;  %v135_v5 = vld [vmem:[%s2610_s1 + $0x18] sm:$0xff] }
  0x14   :  { %v1974_v6 = vpack.c.bf16 %v135_v5, %v134_v3  ;;  %v84_v7 = vld [vmem:[%s2609_s0] sm:$0xff]  ;;  %v137_v9 = vld [vmem:[%s2610_s1 + $0x28] sm:$0xff]  ;;  %v138_v11 = vld [vmem:[%s2610_s1 + $0x30] sm:$0xff] }
  0x15   :  { %1970 = vmatprep.subr.msk.bf16.mxu0 %vm2087_vm1, %v1968_v4  ;;  %v136_v8 = vld [vmem:[%s2610_s1 + $0x20] sm:$0xff]  ;;  %1832 = vmatprep.mubr.msk.f32.mxu0 %vm155_vm0, %v84_v7  ;;  %v139_v12 = vld [vmem:[%s2610_s1 + $0x38] sm:$0xff]  ;;  %v141_v15 = vld [vmem:[%s2610_s1 + $0x48] sm:$0xff] }
  0x16   :  { %1973 = vmatpush3.bf16.xpose.msk.msra.mxu0 %vm2087_vm1, %v1968_v4  ;;  %v1980_v10 = vpack.c.bf16 %v137_v9, %v136_v8  ;;  %v1986_v13 = vpack.c.bf16 %v139_v12, %v138_v11  ;;  %v140_v14 = vld [vmem:[%s2610_s1 + $0x40] sm:$0xff]  ;;  %v142_v17 = vld [vmem:[%s2610_s1 + $0x50] sm:$0xff]  ;;  %v143_v18 = vld [vmem:[%s2610_s1 + $0x58] sm:$0xff]  ;;  %v2047_v8 = vmov 0  }
  0x17   :  { %1976 = vmatprep.subr.msk.bf16.mxu0 %vm2087_vm1, %v1974_v6  ;;  %v1992_v16 = vpack.c.bf16 %v141_v15, %v140_v14  ;;  %v1998_v19 = vpack.c.bf16 %v143_v18, %v142_v17  ;;  %v144_v20 = vld [vmem:[%s2610_s1 + $0x60] sm:$0xff]  ;;  %v145_v21 = vld [vmem:[%s2610_s1 + $0x68] sm:$0xff]  ;;  %v146_v23 = vld [vmem:[%s2610_s1 + $0x70] sm:$0xff]  ;;  %941 = vmatprep.subr.bf16.mxu1 %v2047_v8 }
  0x18   :  { %v2004_v22 = vpack.c.bf16 %v145_v21, %v144_v20  ;;  %v147_v24 = vld [vmem:[%s2610_s1 + $0x78] sm:$0xff]  ;;  %v85_v26 = vld [vmem:[%s2609_s0 + $0x8] sm:$0xff]  ;;  %v86_v27 = vld [vmem:[%s2609_s0 + $0x10] sm:$0xff] }
  0x19   :  { %v2010_v25 = vpack.c.bf16 %v147_v24, %v146_v23  ;;  %v87_v28 = vld [vmem:[%s2609_s0 + $0x18] sm:$0xff]  ;;  %v88_v29 = vld [vmem:[%s2609_s0 + $0x20] sm:$0xff]  ;;  %v89_v30 = vld [vmem:[%s2609_s0 + $0x28] sm:$0xff] }
  0x1a   :  { %v90_v31 = vld [vmem:[%s2609_s0 + $0x30] sm:$0xff]  ;;  %v91_v32 = vld [vmem:[%s2609_s0 + $0x38] sm:$0xff]  ;;  %v92_v33 = vld [vmem:[%s2609_s0 + $0x40] sm:$0xff] }
  0x1b   :  { %v93_v34 = vld [vmem:[%s2609_s0 + $0x48] sm:$0xff]  ;;  %v94_v35 = vld [vmem:[%s2609_s0 + $0x50] sm:$0xff]  ;;  %v95_v36 = vld [vmem:[%s2609_s0 + $0x58] sm:$0xff] }
  0x1c   :  { %v96_v37 = vld [vmem:[%s2609_s0 + $0x60] sm:$0xff]  ;;  %v97_v38 = vld [vmem:[%s2609_s0 + $0x68] sm:$0xff]  ;;  %v98_v39 = vld [vmem:[%s2609_s0 + $0x70] sm:$0xff] }
  0x1d   :  { %v99_v40 = vld [vmem:[%s2609_s0 + $0x78] sm:$0xff]  ;;  %v100_v41 = vld [vmem:[%s2609_s0 + $0x80] sm:$0xff]  ;;  %v101_v42 = vld [vmem:[%s2609_s0 + $0x88] sm:$0xff] }
  0x1e   :  { %1979 = vmatpush3.bf16.xpose.msk.msra.mxu0 %vm2087_vm1, %v1974_v6  ;;  %v102_v43 = vld [vmem:[%s2609_s0 + $0x90] sm:$0xff]  ;;  %v103_v44 = vld [vmem:[%s2609_s0 + $0x98] sm:$0xff]  ;;  %v104_v45 = vld [vmem:[%s2609_s0 + $0xa0] sm:$0xff] }
  0x1f   :  { %1982 = vmatprep.subr.msk.bf16.mxu0 %vm2087_vm1, %v1980_v10  ;;  %v105_v46 = vld [vmem:[%s2609_s0 + $0xa8] sm:$0xff]  ;;  %v106_v47 = vld [vmem:[%s2609_s0 + $0xb0] sm:$0xff]  ;;  %v107_v48 = vld [vmem:[%s2609_s0 + $0xb8] sm:$0xff] }
  0x20   :  { %v108_v49 = vld [vmem:[%s2609_s0 + $0xc0] sm:$0xff]  ;;  %v109_v50 = vld [vmem:[%s2609_s0 + $0xc8] sm:$0xff]  ;;  %v110_v51 = vld [vmem:[%s2609_s0 + $0xd0] sm:$0xff] }
  0x21   :  { %v111_v52 = vld [vmem:[%s2609_s0 + $0xd8] sm:$0xff]  ;;  %v112_v53 = vld [vmem:[%s2609_s0 + $0xe0] sm:$0xff]  ;;  %v113_v54 = vld [vmem:[%s2609_s0 + $0xe8] sm:$0xff] }
  0x22   :  { %v114_v55 = vld [vmem:[%s2609_s0 + $0xf0] sm:$0xff]  ;;  %v115_v56 = vld [vmem:[%s2609_s0 + $0xf8] sm:$0xff]  ;;  %v116_v57 = vld [vmem:[%s2609_s0 + $0x100] sm:$0xff] }
  0x23   :  { %v117_v58 = vld [vmem:[%s2609_s0 + $0x108] sm:$0xff]  ;;  %v118_v59 = vld [vmem:[%s2609_s0 + $0x110] sm:$0xff]  ;;  %v119_v60 = vld [vmem:[%s2609_s0 + $0x118] sm:$0xff] }
  0x24   :  { %v120_v61 = vld [vmem:[%s2609_s0 + $0x120] sm:$0xff]  ;;  %v121_v62 = vld [vmem:[%s2609_s0 + $0x128] sm:$0xff]  ;;  %v122_v63 = vld [vmem:[%s2609_s0 + $0x130] sm:$0xff] }
  0x25   :  { %v123_v0 = vld [vmem:[%s2609_s0 + $0x138] sm:$0xff]  ;;  %v124_v1 = vld [vmem:[%s2609_s0 + $0x140] sm:$0xff]  ;;  %v125_v2 = vld [vmem:[%s2609_s0 + $0x148] sm:$0xff] }
  0x26   :  { %1985 = vmatpush3.bf16.xpose.msk.msra.mxu0 %vm2087_vm1, %v1980_v10  ;;  %v126_v3 = vld [vmem:[%s2609_s0 + $0x150] sm:$0xff]  ;;  %v127_v4 = vld [vmem:[%s2609_s0 + $0x158] sm:$0xff]  ;;  %v128_v5 = vld [vmem:[%s2609_s0 + $0x160] sm:$0xff] }
  0x27   :  { %1988 = vmatprep.subr.msk.bf16.mxu0 %vm2087_vm1, %v1986_v13  ;;  %v129_v6 = vld [vmem:[%s2609_s0 + $0x168] sm:$0xff]  ;;  %v130_v7 = vld [vmem:[%s2609_s0 + $0x170] sm:$0xff]  ;;  %v131_v9 = vld [vmem:[%s2609_s0 + $0x178] sm:$0xff] }
  0x28   :  { %v678_v10 = vld [vmem:[#allocation3 + $0x8] sm:$0xff]  ;;  %v681_v11 = vld [vmem:[#allocation3 + $0x20] sm:$0xff] }
  0x29   :  { %v822_v12 = vpack.c.bf16 %v681_v11, %v678_v10  ;;  %v682_v14 = vld [vmem:[#allocation3 + $0x28] sm:$0xff] }
  0x2b   :  { %973 = vmatprep.mubr.bf16.mxu1 %v822_v12 }
  0x2e   :  { %1991 = vmatpush3.bf16.xpose.msk.msra.mxu0 %vm2087_vm1, %v1986_v13  ;;  %v679_v13 = vld [vmem:[#allocation3 + $0x10] sm:$0xff] }
  0x2f   :  { %1994 = vmatprep.subr.msk.bf16.mxu0 %vm2087_vm1, %v1992_v16  ;;  %v823_v15 = vpack.c.bf16 %v682_v14, %v679_v13 }
  0x36   :  { %1997 = vmatpush3.bf16.xpose.msk.msra.mxu0 %vm2087_vm1, %v1992_v16  ;;  %v2367_v16 = vld [vmem:[%s2611_s2] ss:$0 sm:$0xff] }
  0x37   :  { %2000 = vmatprep.subr.msk.bf16.mxu0 %vm2087_vm1, %v1998_v19 }
  0x3e   :  { %2003 = vmatpush3.bf16.xpose.msk.msra.mxu0 %vm2087_vm1, %v1998_v19 }
  0x3f   :  { %2006 = vmatprep.subr.msk.bf16.mxu0 %vm2087_vm1, %v2004_v22 }
  0x46   :  { %2009 = vmatpush3.bf16.xpose.msk.msra.mxu0 %vm2087_vm1, %v2004_v22 }
  0x47   :  { %2012 = vmatprep.subr.msk.bf16.mxu0 %vm2087_vm1, %v2010_v25 }
  0x4e   :  { %2015 = vmatpush3.bf16.xpose.msk.msra.mxu0 %vm2087_vm1, %v2010_v25 }
  0x55   :  { %1833 = vmatmul.mubr.msk.f32.vlgmr.msra.gmra.mrb[0].mxu0 %vm155_vm0, %v85_v26 }
  0x56   :  { %1835 = vmatprep.mubr.msk.f32.mxu0 %vm155_vm0, %v86_v27 }
  0x59   :  { %1836 = vmatmul.mubr.msk.f32.gmra.mrb[2].mxu0 %vm155_vm0, %v87_v28 }
  0x5a   :  { %1838 = vmatprep.mubr.msk.f32.mxu0 %vm155_vm0, %v88_v29 }
  0x5d   :  { %1839 = vmatmul.mubr.msk.f32.gmra.mrb[4].mxu0 %vm155_vm0, %v89_v30 }
  0x5e   :  { %1841 = vmatprep.mubr.msk.f32.mxu0 %vm155_vm0, %v90_v31 }
  0x61   :  { %1842 = vmatmul.mubr.msk.f32.gmra.mrb[6].mxu0 %vm155_vm0, %v91_v32 }
  0x62   :  { %1844 = vmatprep.mubr.msk.f32.mxu0 %vm155_vm0, %v92_v33 }
  0x65   :  { %1845 = vmatmul.mubr.msk.f32.gmra.mrb[8].mxu0 %vm155_vm0, %v93_v34 }
  0x66   :  { %1847 = vmatprep.mubr.msk.f32.mxu0 %vm155_vm0, %v94_v35 }
  0x69   :  { %1848 = vmatmul.mubr.msk.f32.gmra.mrb[10].mxu0 %vm155_vm0, %v95_v36 }
  0x6a   :  { %1850 = vmatprep.mubr.msk.f32.mxu0 %vm155_vm0, %v96_v37 }
  0x6d   :  { %1851 = vmatmul.mubr.msk.f32.gmra.mrb[12].mxu0 %vm155_vm0, %v97_v38 }
  0x6e   :  { %1853 = vmatprep.mubr.msk.f32.mxu0 %vm155_vm0, %v98_v39 }
  0x71   :  { %1854 = vmatmul.mubr.msk.f32.gmra.mrb[14].mxu0 %vm155_vm0, %v99_v40 }
  0x72   :  { %1856 = vmatprep.mubr.msk.f32.mxu0 %vm155_vm0, %v100_v41 }
  0x75   :  { %1857 = vmatmul.mubr.msk.f32.gmra.mrb[16].mxu0 %vm155_vm0, %v101_v42 }
  0x76   :  { %1859 = vmatprep.mubr.msk.f32.mxu0 %vm155_vm0, %v102_v43 }
  0x79   :  { %1860 = vmatmul.mubr.msk.f32.gmra.mrb[18].mxu0 %vm155_vm0, %v103_v44 }
  0x7a   :  { %1862 = vmatprep.mubr.msk.f32.mxu0 %vm155_vm0, %v104_v45 }
  0x7d   :  { %1863 = vmatmul.mubr.msk.f32.gmra.mrb[20].mxu0 %vm155_vm0, %v105_v46 }
  0x7e   :  { %1865 = vmatprep.mubr.msk.f32.mxu0 %vm155_vm0, %v106_v47 }
  0x81   :  { %1866 = vmatmul.mubr.msk.f32.gmra.mrb[22].mxu0 %vm155_vm0, %v107_v48 }
  0x82   :  { %1868 = vmatprep.mubr.msk.f32.mxu0 %vm155_vm0, %v108_v49 }
  0x85   :  { %1869 = vmatmul.mubr.msk.f32.gmra.mrb[24].mxu0 %vm155_vm0, %v109_v50 }
  0x86   :  { %1871 = vmatprep.mubr.msk.f32.mxu0 %vm155_vm0, %v110_v51 }
  0x89   :  { %1872 = vmatmul.mubr.msk.f32.gmra.mrb[26].mxu0 %vm155_vm0, %v111_v52 }
  0x8a   :  { %1874 = vmatprep.mubr.msk.f32.mxu0 %vm155_vm0, %v112_v53 }
  0x8d   :  { %1875 = vmatmul.mubr.msk.f32.gmra.mrb[28].mxu0 %vm155_vm0, %v113_v54 }
  0x8e   :  { %1877 = vmatprep.mubr.msk.f32.mxu0 %vm155_vm0, %v114_v55 }
  0x91   :  { %1878 = vmatmul.mubr.msk.f32.gmra.mrb[30].mxu0 %vm155_vm0, %v115_v56 }
  0x92   :  { %1880 = vmatprep.mubr.msk.f32.mxu0 %vm155_vm0, %v116_v57 }
  0x95   :  { %1881 = vmatmul.mubr.msk.f32.gmra.mrb[32].mxu0 %vm155_vm0, %v117_v58 }
  0x96   :  { %1883 = vmatprep.mubr.msk.f32.mxu0 %vm155_vm0, %v118_v59 }
  0x99   :  { %1884 = vmatmul.mubr.msk.f32.gmra.mrb[34].mxu0 %vm155_vm0, %v119_v60 }
  0x9a   :  { %1886 = vmatprep.mubr.msk.f32.mxu0 %vm155_vm0, %v120_v61 }
  0x9d   :  { %1887 = vmatmul.mubr.msk.f32.gmra.mrb[36].mxu0 %vm155_vm0, %v121_v62 }
  0x9e   :  { %1889 = vmatprep.mubr.msk.f32.mxu0 %vm155_vm0, %v122_v63 }
  0xa1   :  { %1890 = vmatmul.mubr.msk.f32.gmra.mrb[38].mxu0 %vm155_vm0, %v123_v0 }
  0xa2   :  { %1892 = vmatprep.mubr.msk.f32.mxu0 %vm155_vm0, %v124_v1 }
  0xa5   :  { %1893 = vmatmul.mubr.msk.f32.gmra.mrb[40].mxu0 %vm155_vm0, %v125_v2 }
  0xa6   :  { %1895 = vmatprep.mubr.msk.f32.mxu0 %vm155_vm0, %v126_v3 }
  0xa9   :  { %1896 = vmatmul.mubr.msk.f32.gmra.mrb[42].mxu0 %vm155_vm0, %v127_v4 }
  0xaa   :  { %1898 = vmatprep.mubr.msk.f32.mxu0 %vm155_vm0, %v128_v5 }
  0xad   :  { %1899 = vmatmul.mubr.msk.f32.gmra.mrb[44].mxu0 %vm155_vm0, %v129_v6 }
  0xae   :  { %1901 = vmatprep.mubr.msk.f32.mxu0 %vm155_vm0, %v130_v7 }
  0xb1   :  { %1902 = vmatmul.mubr.msk.f32.gmra.mrb[46].mxu0 %vm155_vm0, %v131_v9 }
  0xb2   :  { %1920 = vmatprep.mubr.bf16.mxu0 %v823_v15 }
 0x128   :  { %v1834_v17 = vpop.f32.mrb[0].mxu0 }
 0x129   :  { %v420_v18 = vadd.f32 %v1834_v17, %v2367_v16  ;;  %v414_v19 = vpop.f32.mrb[1].mxu0 }
 0x12a   :  { %v415_v20 = vadd.f32 %v2367_v16, %v414_v19 }
 0x12c   :  { %v1837_v21 = vpop.f32.mrb[2].mxu0  ;;  %v653_v22 = vpack.c.bf16 %v420_v18, %v415_v20 }
 0x12d   :  { %v430_v23 = vadd.f32 %v1837_v21, %v2367_v16  ;;  %v424_v24 = vpop.f32.mrb[3].mxu0 }
 0x12e   :  { %v425_v25 = vadd.f32 %v2367_v16, %v424_v24  ;;  %942 = vmatpush1.bf16.msra.mxu1 %v653_v22 }
 0x12f   :  { %943 = vmatprep.subr.bf16.mxu1 %v2047_v8 }
 0x130   :  { %v654_v26 = vpack.c.bf16 %v430_v23, %v425_v25  ;;  %v1840_v27 = vpop.f32.mrb[4].mxu0 }
 0x131   :  { %v440_v28 = vadd.f32 %v1840_v27, %v2367_v16  ;;  %v434_v29 = vpop.f32.mrb[5].mxu0 }
 0x132   :  { %v435_v30 = vadd.f32 %v2367_v16, %v434_v29  ;;  %944 = vmatpush1.bf16.msra.mxu1 %v654_v26 }
 0x133   :  { %945 = vmatprep.subr.bf16.mxu1 %v2047_v8 }
 0x134   :  { %v655_v31 = vpack.c.bf16 %v440_v28, %v435_v30  ;;  %v1843_v32 = vpop.f32.mrb[6].mxu0 }
 0x135   :  { %v450_v33 = vadd.f32 %v1843_v32, %v2367_v16  ;;  %v444_v34 = vpop.f32.mrb[7].mxu0 }
 0x136   :  { %v445_v35 = vadd.f32 %v2367_v16, %v444_v34  ;;  %946 = vmatpush1.bf16.msra.mxu1 %v655_v31  ;;  %v677_v34 = vld [vmem:[#allocation3] sm:$0xff] }
 0x137   :  { %947 = vmatprep.subr.bf16.mxu1 %v2047_v8 }
 0x138   :  { %v656_v36 = vpack.c.bf16 %v450_v33, %v445_v35  ;;  %v1846_v37 = vpop.f32.mrb[8].mxu0  ;;  %v680_v35 = vld [vmem:[#allocation3 + $0x18] sm:$0xff] }
 0x139   :  { %v460_v38 = vadd.f32 %v1846_v37, %v2367_v16  ;;  %v454_v39 = vpop.f32.mrb[9].mxu0  ;;  %v687_v37 = vld [vmem:[#allocation3 + $0x50] sm:$0xff] }
 0x13a   :  { %v455_v40 = vadd.f32 %v2367_v16, %v454_v39  ;;  %948 = vmatpush1.bf16.msra.mxu1 %v656_v36  ;;  %v684_v36 = vld [vmem:[#allocation3 + $0x38] sm:$0xff] }
 0x13b   :  { %949 = vmatprep.subr.bf16.mxu1 %v2047_v8 }
 0x13c   :  { %v657_v41 = vpack.c.bf16 %v460_v38, %v455_v40  ;;  %v1849_v42 = vpop.f32.mrb[10].mxu0 }
 0x13d   :  { %v470_v43 = vadd.f32 %v1849_v42, %v2367_v16  ;;  %v464_v44 = vpop.f32.mrb[11].mxu0  ;;  %v821_v42 = vpack.c.bf16 %v680_v35, %v677_v34  ;;  %v701_v35 = vld [vmem:[#allocation3 + $0xc0] sm:$0xff] }
 0x13e   :  { %v465_v45 = vadd.f32 %v2367_v16, %v464_v44  ;;  %950 = vmatpush1.bf16.msra.mxu1 %v657_v41  ;;  %v825_v44 = vpack.c.bf16 %v687_v37, %v684_v36  ;;  %v704_v36 = vld [vmem:[#allocation3 + $0xd8] sm:$0xff]  ;;  %v685_v37 = vld [vmem:[#allocation3 + $0x40] sm:$0xff] }
 0x13f   :  { %951 = vmatprep.subr.bf16.mxu1 %v2047_v8 }
 0x140   :  { %v658_v46 = vpack.c.bf16 %v470_v43, %v465_v45  ;;  %v1852_v47 = vpop.f32.mrb[12].mxu0 }
 0x141   :  { %v480_v48 = vadd.f32 %v1852_v47, %v2367_v16  ;;  %v474_v49 = vpop.f32.mrb[13].mxu0 }
 0x142   :  { %v475_v50 = vadd.f32 %v2367_v16, %v474_v49  ;;  %952 = vmatpush1.bf16.msra.mxu1 %v658_v46  ;;  %v683_v49 = vld [vmem:[#allocation3 + $0x30] sm:$0xff] }
 0x143   :  { %953 = vmatprep.subr.bf16.mxu1 %v2047_v8 }
 0x144   :  { %v659_v51 = vpack.c.bf16 %v480_v48, %v475_v50  ;;  %v1855_v52 = vpop.f32.mrb[14].mxu0  ;;  %v686_v50 = vld [vmem:[#allocation3 + $0x48] sm:$0xff] }
 0x145   :  { %v490_v53 = vadd.f32 %v1855_v52, %v2367_v16  ;;  %v484_v54 = vpop.f32.mrb[15].mxu0  ;;  %v693_v52 = vld [vmem:[#allocation3 + $0x80] sm:$0xff] }
 0x146   :  { %v485_v55 = vadd.f32 %v2367_v16, %v484_v54  ;;  %954 = vmatpush1.bf16.msra.mxu1 %v659_v51  ;;  %v690_v51 = vld [vmem:[#allocation3 + $0x68] sm:$0xff] }
 0x147   :  { %955 = vmatprep.subr.bf16.mxu1 %v2047_v8 }
 0x148   :  { %v660_v56 = vpack.c.bf16 %v490_v53, %v485_v55  ;;  %v1858_v57 = vpop.f32.mrb[16].mxu0 }
 0x149   :  { %v500_v58 = vadd.f32 %v1858_v57, %v2367_v16  ;;  %v494_v59 = vpop.f32.mrb[17].mxu0  ;;  %v824_v57 = vpack.c.bf16 %v686_v50, %v683_v49  ;;  %v700_v49 = vld [vmem:[#allocation3 + $0xb8] sm:$0xff]  ;;  %v714_v50 = vld [vmem:[#allocation3 + $0x128] sm:$0xff] }
 0x14a   :  { %v495_v60 = vadd.f32 %v2367_v16, %v494_v59  ;;  %956 = vmatpush1.bf16.msra.mxu1 %v660_v56  ;;  %v828_v59 = vpack.c.bf16 %v693_v52, %v690_v51  ;;  %v717_v51 = vld [vmem:[#allocation3 + $0x140] sm:$0xff]  ;;  %v703_v52 = vld [vmem:[#allocation3 + $0xd0] sm:$0xff] }
 0x14b   :  { %957 = vmatprep.subr.bf16.mxu1 %v2047_v8 }
 0x14c   :  { %v661_v61 = vpack.c.bf16 %v500_v58, %v495_v60  ;;  %v1861_v62 = vpop.f32.mrb[18].mxu0 }
 0x14d   :  { %v510_v63 = vadd.f32 %v1861_v62, %v2367_v16  ;;  %v504_v0 = vpop.f32.mrb[19].mxu0 }
 0x14e   :  { %v505_v1 = vadd.f32 %v2367_v16, %v504_v0  ;;  %958 = vmatpush1.bf16.msra.mxu1 %v661_v61 }
 0x14f   :  { %959 = vmatprep.subr.bf16.mxu1 %v2047_v8 }
 0x150   :  { %v662_v2 = vpack.c.bf16 %v510_v63, %v505_v1  ;;  %v1864_v3 = vpop.f32.mrb[20].mxu0  ;;  %v689_v1 = vld [vmem:[#allocation3 + $0x60] sm:$0xff] }
 0x151   :  { %v520_v4 = vadd.f32 %v1864_v3, %v2367_v16  ;;  %v514_v5 = vpop.f32.mrb[21].mxu0  ;;  %v696_v3 = vld [vmem:[#allocation3 + $0x98] sm:$0xff] }
 0x152   :  { %v515_v6 = vadd.f32 %v2367_v16, %v514_v5  ;;  %960 = vmatpush1.bf16.msra.mxu1 %v662_v2  ;;  %v692_v2 = vld [vmem:[#allocation3 + $0x78] sm:$0xff] }
 0x153   :  { %961 = vmatprep.subr.bf16.mxu1 %v2047_v8 }
 0x154   :  { %v663_v7 = vpack.c.bf16 %v520_v4, %v515_v6  ;;  %v1867_v9 = vpop.f32.mrb[22].mxu0  ;;  %v699_v4 = vld [vmem:[#allocation3 + $0xb0] sm:$0xff] }
 0x155   :  { %v530_v10 = vadd.f32 %v1867_v9, %v2367_v16  ;;  %v524_v11 = vpop.f32.mrb[23].mxu0 }
 0x156   :  { %v525_v12 = vadd.f32 %v2367_v16, %v524_v11  ;;  %962 = vmatpush1.bf16.msra.mxu1 %v663_v7 }
 0x157   :  { %963 = vmatprep.subr.bf16.mxu1 %v2047_v8 }
 0x158   :  { %v664_v13 = vpack.c.bf16 %v530_v10, %v525_v12  ;;  %v1870_v14 = vpop.f32.mrb[24].mxu0  ;;  %v827_v10 = vpack.c.bf16 %v692_v2, %v689_v1  ;;  %v831_v12 = vpack.c.bf16 %v699_v4, %v696_v3  ;;  %v718_v1 = vld [vmem:[#allocation3 + $0x148] sm:$0xff] }
 0x159   :  { %v540_v15 = vadd.f32 %v1870_v14, %v2367_v16  ;;  %v534_v17 = vpop.f32.mrb[25].mxu0 }
 0x15a   :  { %v535_v18 = vadd.f32 %v2367_v16, %v534_v17  ;;  %964 = vmatpush1.bf16.msra.mxu1 %v664_v13 }
 0x15b   :  { %965 = vmatprep.subr.bf16.mxu1 %v2047_v8 }
 0x15c   :  { %v665_v19 = vpack.c.bf16 %v540_v15, %v535_v18  ;;  %v1873_v20 = vpop.f32.mrb[26].mxu0 }
 0x15d   :  { %v550_v21 = vadd.f32 %v1873_v20, %v2367_v16  ;;  %v544_v22 = vpop.f32.mrb[27].mxu0  ;;  %v698_v20 = vld [vmem:[#allocation3 + $0xa8] sm:$0xff] }
 0x15e   :  { %v545_v23 = vadd.f32 %v2367_v16, %v544_v22  ;;  %966 = vmatpush1.bf16.msra.mxu1 %v665_v19  ;;  %v695_v19 = vld [vmem:[#allocation3 + $0x90] sm:$0xff]  ;;  %v705_v22 = vld [vmem:[#allocation3 + $0xe0] sm:$0xff] }
 0x15f   :  { %967 = vmatprep.subr.bf16.mxu1 %v2047_v8 }
 0x160   :  { %v666_v24 = vpack.c.bf16 %v550_v21, %v545_v23  ;;  %v1876_v25 = vpop.f32.mrb[28].mxu0  ;;  %v702_v21 = vld [vmem:[#allocation3 + $0xc8] sm:$0xff] }
 0x161   :  { %v560_v26 = vadd.f32 %v1876_v25, %v2367_v16  ;;  %v554_v27 = vpop.f32.mrb[29].mxu0 }
 0x162   :  { %v555_v28 = vadd.f32 %v2367_v16, %v554_v27  ;;  %968 = vmatpush1.bf16.msra.mxu1 %v666_v24  ;;  %v830_v27 = vpack.c.bf16 %v698_v20, %v695_v19  ;;  %v725_v20 = vld [vmem:[#allocation3 + $0x180] sm:$0xff] }
 0x163   :  { %969 = vmatprep.subr.bf16.mxu1 %v2047_v8 }
 0x164   :  { %v667_v29 = vpack.c.bf16 %v560_v26, %v555_v28  ;;  %v1879_v30 = vpop.f32.mrb[30].mxu0 }
 0x165   :  { %v570_v31 = vadd.f32 %v1879_v30, %v2367_v16  ;;  %v564_v32 = vpop.f32.mrb[31].mxu0 }
 0x166   :  { %v565_v33 = vadd.f32 %v2367_v16, %v564_v32  ;;  %970 = vmatpush1.bf16.msra.mxu1 %v667_v29  ;;  %v834_v29 = vpack.c.bf16 %v705_v22, %v702_v21  ;;  %v728_v21 = vld [vmem:[#allocation3 + $0x198] sm:$0xff]  ;;  %v733_v22 = vld [vmem:[#allocation3 + $0x1c0] sm:$0xff] }
 0x167   :  { %971 = vmatprep.subr.bf16.mxu1 %v2047_v8 }
 0x168   :  { %v668_v38 = vpack.c.bf16 %v570_v31, %v565_v33  ;;  %v1882_v39 = vpop.f32.mrb[32].mxu0 }
 0x169   :  { %v580_v40 = vadd.f32 %v1882_v39, %v2367_v16  ;;  %v574_v41 = vpop.f32.mrb[33].mxu0  ;;  %v708_v39 = vld [vmem:[#allocation3 + $0xf8] sm:$0xff] }
 0x16a   :  { %v575_v43 = vadd.f32 %v2367_v16, %v574_v41  ;;  %972 = vmatpush1.bf16.msra.mxu1 %v668_v38  ;;  %v688_v38 = vld [vmem:[#allocation3 + $0x58] sm:$0xff] }
 0x16c   :  { %v669_v45 = vpack.c.bf16 %v580_v40, %v575_v43  ;;  %v1885_v46 = vpop.f32.mrb[34].mxu0  ;;  %v711_v40 = vld [vmem:[#allocation3 + $0x110] sm:$0xff]  ;;  %v694_v43 = vld [vmem:[#allocation3 + $0x88] sm:$0xff] }
 0x16d   :  { %v590_v47 = vadd.f32 %v1885_v46, %v2367_v16  ;;  %v584_v48 = vpop.f32.mrb[35].mxu0  ;;  %974 = vmatmul.mubr.bf16.vlgmr.msra.gmra.mrb[0].mxu1 %v821_v42  ;;  %v691_v42 = vld [vmem:[#allocation3 + $0x70] sm:$0xff]  ;;  %v837_v46 = vpack.c.bf16 %v711_v40, %v708_v39  ;;  %v754_v39 = vld [vmem:[#allocation3 + $0x268] sm:$0xff] }
 0x16e   :  { %v585_v8 = vadd.f32 %v2367_v16, %v584_v48  ;;  %1904 = vmatprep.subr.bf16.mxu0 %v669_v45  ;;  %981 = vmatprep.mubr.bf16.mxu1 %v825_v44  ;;  %v833_v44 = vpack.c.bf16 %v704_v36, %v701_v35  ;;  %v710_v48 = vld [vmem:[#allocation3 + $0x108] sm:$0xff]  ;;  %v741_v35 = vld [vmem:[#allocation3 + $0x200] sm:$0xff] }
 0x16f   :  { %1905 = vmatpush3.bf16.msra.mxu0 %v669_v45  ;;  %v826_v45 = vpack.c.bf16 %v688_v38, %v685_v37  ;;  %v745_v36 = vld [vmem:[#allocation3 + $0x220] sm:$0xff]  ;;  %v748_v37 = vld [vmem:[#allocation3 + $0x238] sm:$0xff]  ;;  %v751_v38 = vld [vmem:[#allocation3 + $0x250] sm:$0xff] }
 0x170   :  { %v670_v53 = vpack.c.bf16 %v590_v47, %v585_v8  ;;  %v1888_v54 = vpop.f32.mrb[36].mxu0  ;;  %v829_v47 = vpack.c.bf16 %v694_v43, %v691_v42  ;;  %v697_v8 = vld [vmem:[#allocation3 + $0xa0] sm:$0xff]  ;;  %v856_v42 = vpack.c.bf16 %v748_v37, %v745_v36  ;;  %v859_v43 = vpack.c.bf16 %v754_v39, %v751_v38 }
 0x171   :  { %v600_v55 = vadd.f32 %v1888_v54, %v2367_v16  ;;  %v594_v56 = vpop.f32.mrb[37].mxu0 }
 0x172   :  { %v595_v58 = vadd.f32 %v2367_v16, %v594_v56  ;;  %1906 = vmatprep.subr.bf16.mxu0 %v670_v53  ;;  %v840_v56 = vpack.c.bf16 %v717_v51, %v714_v50 }
 0x173   :  { %1907 = vmatpush3.bf16.msra.mxu0 %v670_v53  ;;  %v706_v53 = vld [vmem:[#allocation3 + $0xe8] sm:$0xff] }
 0x174   :  { %v671_v60 = vpack.c.bf16 %v600_v55, %v595_v58  ;;  %v1891_v61 = vpop.f32.mrb[38].mxu0  ;;  %v832_v55 = vpack.c.bf16 %v700_v49, %v697_v8  ;;  %v713_v58 = vld [vmem:[#allocation3 + $0x120] sm:$0xff]  ;;  %v763_v8 = vld [vmem:[#allocation3 + $0x2b0] sm:$0xff]  ;;  %v766_v49 = vld [vmem:[#allocation3 + $0x2c8] sm:$0xff] }
 0x175   :  { %v610_v62 = vadd.f32 %v1891_v61, %v2367_v16  ;;  %v604_v63 = vpop.f32.mrb[39].mxu0  ;;  %982 = vmatmul.mubr.bf16.gmra.mrb[4].mxu1 %v824_v57  ;;  %v835_v57 = vpack.c.bf16 %v706_v53, %v703_v52  ;;  %v712_v61 = vld [vmem:[#allocation3 + $0x118] sm:$0xff]  ;;  %v865_v53 = vpack.c.bf16 %v766_v49, %v763_v8 }
 0x176   :  { %v605_v0 = vadd.f32 %v2367_v16, %v604_v63  ;;  %1908 = vmatprep.subr.bf16.mxu0 %v671_v60  ;;  %989 = vmatprep.mubr.bf16.mxu1 %v828_v59  ;;  %v716_v59 = vld [vmem:[#allocation3 + $0x138] sm:$0xff]  ;;  %v723_v63 = vld [vmem:[#allocation3 + $0x170] sm:$0xff] }
 0x177   :  { %1909 = vmatpush3.bf16.msra.mxu0 %v671_v60  ;;  %v709_v60 = vld [vmem:[#allocation3 + $0x100] sm:$0xff]  ;;  %v839_v2 = vpack.c.bf16 %v716_v59, %v713_v58  ;;  %v772_v59 = vld [vmem:[#allocation3 + $0x2f8] sm:$0xff] }
 0x178   :  { %v672_v5 = vpack.c.bf16 %v610_v62, %v605_v0  ;;  %v1894_v6 = vpop.f32.mrb[40].mxu0  ;;  %v720_v62 = vld [vmem:[#allocation3 + $0x158] sm:$0xff]  ;;  %v715_v0 = vld [vmem:[#allocation3 + $0x130] sm:$0xff]  ;;  %v838_v3 = vpack.c.bf16 %v712_v61, %v709_v60  ;;  %v769_v58 = vld [vmem:[#allocation3 + $0x2e0] sm:$0xff] }
 0x179   :  { %v620_v7 = vadd.f32 %v1894_v6, %v2367_v16  ;;  %v614_v9 = vpop.f32.mrb[41].mxu0  ;;  %v843_v4 = vpack.c.bf16 %v723_v63, %v720_v62  ;;  %v719_v6 = vld [vmem:[#allocation3 + $0x150] sm:$0xff]  ;;  %v778_v61 = vld [vmem:[#allocation3 + $0x328] sm:$0xff]  ;;  %v776_v8 = vld [vmem:[#allocation3 + $0x318] sm:$0xff] }
 0x17a   :  { %v615_v11 = vadd.f32 %v2367_v16, %v614_v9  ;;  %1910 = vmatprep.subr.bf16.mxu0 %v672_v5  ;;  %v721_v9 = vld [vmem:[#allocation3 + $0x160] sm:$0xff]  ;;  %v775_v60 = vld [vmem:[#allocation3 + $0x310] sm:$0xff]  ;;  %v780_v49 = vld [vmem:[#allocation3 + $0x338] sm:$0xff] }
 0x17b   :  { %1911 = vmatpush3.bf16.msra.mxu0 %v672_v5  ;;  %v841_v5 = vpack.c.bf16 %v718_v1, %v715_v0  ;;  %v868_v0 = vpack.c.bf16 %v772_v59, %v769_v58  ;;  %v871_v1 = vpack.c.bf16 %v778_v61, %v775_v60  ;;  %v785_v59 = vld [vmem:[#allocation3 + $0x360] sm:$0xff]  ;;  %v788_v60 = vld [vmem:[#allocation3 + $0x378] sm:$0xff] }
 0x17c   :  { %v673_v13 = vpack.c.bf16 %v620_v7, %v615_v11  ;;  %v1897_v14 = vpop.f32.mrb[42].mxu0  ;;  %v722_v7 = vld [vmem:[#allocation3 + $0x168] sm:$0xff]  ;;  %v792_v61 = vld [vmem:[#allocation3 + $0x398] sm:$0xff] }
 0x17d   :  { %v630_v15 = vadd.f32 %v1897_v14, %v2367_v16  ;;  %v624_v17 = vpop.f32.mrb[43].mxu0  ;;  %990 = vmatmul.mubr.bf16.gmra.mrb[8].mxu1 %v827_v10  ;;  %v724_v10 = vld [vmem:[#allocation3 + $0x178] sm:$0xff]  ;;  %v726_v11 = vld [vmem:[#allocation3 + $0x188] sm:$0xff] }
 0x17e   :  { %v625_v18 = vadd.f32 %v2367_v16, %v624_v17  ;;  %1912 = vmatprep.subr.bf16.mxu0 %v673_v13  ;;  %997 = vmatprep.mubr.bf16.mxu1 %v831_v12  ;;  %v729_v12 = vld [vmem:[#allocation3 + $0x1a0] sm:$0xff]  ;;  %v730_v14 = vld [vmem:[#allocation3 + $0x1a8] sm:$0xff]  ;;  %v844_v17 = vpack.c.bf16 %v724_v10, %v721_v9  ;;  %v787_v9 = vld [vmem:[#allocation3 + $0x370] sm:$0xff] }
 0x17f   :  { %1913 = vmatpush3.bf16.msra.mxu0 %v673_v13  ;;  %v727_v13 = vld [vmem:[#allocation3 + $0x190] sm:$0xff]  ;;  %v790_v10 = vld [vmem:[#allocation3 + $0x388] sm:$0xff] }
 0x180   :  { %v674_v23 = vpack.c.bf16 %v630_v15, %v625_v18  ;;  %v1900_v24 = vpop.f32.mrb[44].mxu0  ;;  %v842_v15 = vpack.c.bf16 %v722_v7, %v719_v6  ;;  %v846_v18 = vpack.c.bf16 %v729_v12, %v726_v11  ;;  %v847_v19 = vpack.c.bf16 %v730_v14, %v727_v13  ;;  %v781_v6 = vld [vmem:[#allocation3 + $0x340] sm:$0xff]  ;;  %v784_v7 = vld [vmem:[#allocation3 + $0x358] sm:$0xff] }
 0x181   :  { %v640_v25 = vadd.f32 %v1900_v24, %v2367_v16  ;;  %v634_v26 = vpop.f32.mrb[45].mxu0  ;;  %v732_v24 = vld [vmem:[#allocation3 + $0x1b8] sm:$0xff]  ;;  %v874_v13 = vpack.c.bf16 %v784_v7, %v781_v6  ;;  %v877_v14 = vpack.c.bf16 %v790_v10, %v787_v9  ;;  %v797_v7 = vld [vmem:[#allocation3 + $0x3c0] sm:$0xff] }
 0x182   :  { %v635_v28 = vadd.f32 %v2367_v16, %v634_v26  ;;  %1914 = vmatprep.subr.bf16.mxu0 %v674_v23  ;;  %v739_v26 = vld [vmem:[#allocation3 + $0x1f0] sm:$0xff]  ;;  %v800_v9 = vld [vmem:[#allocation3 + $0x3d8] sm:$0xff] }
 0x183   :  { %1915 = vmatpush3.bf16.msra.mxu0 %v674_v23  ;;  %v736_v23 = vld [vmem:[#allocation3 + $0x1d8] sm:$0xff] }
 0x184   :  { %v675_v30 = vpack.c.bf16 %v640_v25, %v635_v28  ;;  %v1903_v31 = vpop.f32.mrb[46].mxu0  ;;  %v735_v25 = vld [vmem:[#allocation3 + $0x1d0] sm:$0xff]  ;;  %v845_v28 = vpack.c.bf16 %v728_v21, %v725_v20  ;;  %v793_v20 = vld [vmem:[#allocation3 + $0x3a0] sm:$0xff]  ;;  %v796_v21 = vld [vmem:[#allocation3 + $0x3b8] sm:$0xff] }
 0x185   :  { %v650_v32 = vadd.f32 %v1903_v31, %v2367_v16  ;;  %v644_v33 = vpop.f32.mrb[47].mxu0  ;;  %998 = vmatmul.mubr.bf16.gmra.mrb[12].mxu1 %v830_v27  ;;  %v742_v27 = vld [vmem:[#allocation3 + $0x208] sm:$0xff]  ;;  %v804_v10 = vld [vmem:[#allocation3 + $0x3f8] sm:$0xff] }
 0x186   :  { %v645_v34 = vadd.f32 %v2367_v16, %v644_v33  ;;  %1916 = vmatprep.subr.bf16.mxu0 %v675_v30  ;;  %1005 = vmatprep.mubr.bf16.mxu1 %v834_v29  ;;  %v707_v16 = vld [vmem:[#allocation3 + $0xf0] sm:$0xff]  ;;  %v850_v29 = vpack.c.bf16 %v736_v23, %v733_v22  ;;  %v853_v31 = vpack.c.bf16 %v742_v27, %v739_v26  ;;  %v734_v33 = vld [vmem:[#allocation3 + $0x1c8] sm:$0xff] }
 0x187   :  { %1917 = vmatpush3.bf16.msra.mxu0 %v675_v30  ;;  %v836_v54 = vpack.c.bf16 %v710_v48, %v707_v16  ;;  %v849_v30 = vpack.c.bf16 %v735_v25, %v732_v24  ;;  %v757_v16 = vld [vmem:[#allocation3 + $0x280] sm:$0xff]  ;;  %v760_v48 = vld [vmem:[#allocation3 + $0x298] sm:$0xff]  ;;  %v799_v22 = vld [vmem:[#allocation3 + $0x3d0] sm:$0xff]  ;;  %v880_v26 = vpack.c.bf16 %v796_v21, %v793_v20 }
 0x188   :  { %v676_v41 = vpack.c.bf16 %v650_v32, %v645_v34  ;;  %v731_v32 = vld [vmem:[#allocation3 + $0x1b0] sm:$0xff]  ;;  %v738_v34 = vld [vmem:[#allocation3 + $0x1e8] sm:$0xff]  ;;  %v862_v52 = vpack.c.bf16 %v760_v48, %v757_v16  ;;  %v773_v48 = vld [vmem:[#allocation3 + $0x300] sm:$0xff] }
 0x189   :  { %v848_v40 = vpack.c.bf16 %v734_v33, %v731_v32  ;;  %v802_v23 = vld [vmem:[#allocation3 + $0x3e8] sm:$0xff]  ;;  %v805_v32 = vld [vmem:[#allocation3 + $0x400] sm:$0xff]  ;;  %v808_v33 = vld [vmem:[#allocation3 + $0x418] sm:$0xff] }
 0x18a   :  { %1918 = vmatprep.subr.bf16.mxu0 %v676_v41  ;;  %v883_v27 = vpack.c.bf16 %v802_v23, %v799_v22  ;;  %v886_v38 = vpack.c.bf16 %v808_v33, %v805_v32  ;;  %v809_v21 = vld [vmem:[#allocation3 + $0x420] sm:$0xff]  ;;  %v812_v22 = vld [vmem:[#allocation3 + $0x438] sm:$0xff] }
 0x18b   :  { %1919 = vmatpush3.bf16.msra.mxu0 %v676_v41  ;;  %v852_v41 = vpack.c.bf16 %v741_v35, %v738_v34  ;;  %v811_v34 = vld [vmem:[#allocation3 + $0x430] sm:$0xff]  ;;  %v814_v35 = vld [vmem:[#allocation3 + $0x448] sm:$0xff]  ;;  %v816_v23 = vld [vmem:[#allocation3 + $0x458] sm:$0xff] }
 0x18c   :  { %v889_v39 = vpack.c.bf16 %v814_v35, %v811_v34 }
 0x18d   :  { %1006 = vmatmul.mubr.bf16.gmra.mrb[16].mxu1 %v833_v44  ;;  %v737_v44 = vld [vmem:[#allocation3 + $0x1e0] sm:$0xff] }
 0x18e   :  { %1921 = vmatmul.mubr.bf16.vlgmr.msra.gmra.mrb[48].mxu0 %v826_v45  ;;  %1013 = vmatprep.mubr.bf16.mxu1 %v837_v46  ;;  %v740_v45 = vld [vmem:[#allocation3 + $0x1f8] sm:$0xff] }
 0x18f   :  { %1924 = vmatprep.mubr.bf16.mxu0 %v829_v47  ;;  %v744_v46 = vld [vmem:[#allocation3 + $0x218] sm:$0xff]  ;;  %v747_v47 = vld [vmem:[#allocation3 + $0x230] sm:$0xff]  ;;  %v851_v50 = vpack.c.bf16 %v740_v45, %v737_v44  ;;  %v817_v44 = vld [vmem:[#allocation3 + $0x460] sm:$0xff] }
 0x190   :  { %v855_v51 = vpack.c.bf16 %v747_v47, %v744_v46  ;;  %v820_v45 = vld [vmem:[#allocation3 + $0x478] sm:$0xff] }
 0x191   :  { %v892_v16 = vpack.c.bf16 %v820_v45, %v817_v44 }
 0x195   :  { %1014 = vmatmul.mubr.bf16.gmra.mrb[20].mxu1 %v836_v54  ;;  %v743_v54 = vld [vmem:[#allocation3 + $0x210] sm:$0xff] }
 0x196   :  { %1925 = vmatmul.mubr.bf16.gmra.mrb[52].mxu0 %v832_v55  ;;  %1021 = vmatprep.mubr.bf16.mxu1 %v840_v56  ;;  %v746_v55 = vld [vmem:[#allocation3 + $0x228] sm:$0xff] }
 0x197   :  { %1928 = vmatprep.mubr.bf16.mxu0 %v835_v57  ;;  %v750_v56 = vld [vmem:[#allocation3 + $0x248] sm:$0xff]  ;;  %v753_v57 = vld [vmem:[#allocation3 + $0x260] sm:$0xff]  ;;  %v854_v62 = vpack.c.bf16 %v746_v55, %v743_v54 }
 0x198   :  { %v858_v63 = vpack.c.bf16 %v753_v57, %v750_v56  ;;  %v782_v54 = vld [vmem:[#allocation3 + $0x348] sm:$0xff]  ;;  %v789_v56 = vld [vmem:[#allocation3 + $0x380] sm:$0xff] }
 0x199   :  { %v786_v55 = vld [vmem:[#allocation3 + $0x368] sm:$0xff] }
 0x19a   :  { %v876_v58 = vpack.c.bf16 %v789_v56, %v786_v55 }
 0x19d   :  { %1022 = vmatmul.mubr.bf16.gmra.mrb[24].mxu1 %v839_v2  ;;  %v749_v2 = vld [vmem:[#allocation3 + $0x240] sm:$0xff] }
 0x19e   :  { %1929 = vmatmul.mubr.bf16.gmra.mrb[56].mxu0 %v838_v3  ;;  %1029 = vmatprep.mubr.bf16.mxu1 %v843_v4  ;;  %v752_v3 = vld [vmem:[#allocation3 + $0x258] sm:$0xff] }
 0x19f   :  { %1932 = vmatprep.mubr.bf16.mxu0 %v841_v5  ;;  %v756_v4 = vld [vmem:[#allocation3 + $0x278] sm:$0xff]  ;;  %v759_v5 = vld [vmem:[#allocation3 + $0x290] sm:$0xff]  ;;  %v857_v11 = vpack.c.bf16 %v752_v3, %v749_v2  ;;  %v794_v2 = vld [vmem:[#allocation3 + $0x3a8] sm:$0xff] }
 0x1a0   :  { %v861_v12 = vpack.c.bf16 %v759_v5, %v756_v4  ;;  %v798_v3 = vld [vmem:[#allocation3 + $0x3c8] sm:$0xff]  ;;  %v801_v4 = vld [vmem:[#allocation3 + $0x3e0] sm:$0xff] }
 0x1a1   :  { %v882_v6 = vpack.c.bf16 %v801_v4, %v798_v3 }
 0x1a5   :  { %1030 = vmatmul.mubr.bf16.gmra.mrb[28].mxu1 %v842_v15  ;;  %v755_v15 = vld [vmem:[#allocation3 + $0x270] sm:$0xff] }
 0x1a6   :  { %1933 = vmatmul.mubr.bf16.gmra.mrb[60].mxu0 %v844_v17  ;;  %1037 = vmatprep.mubr.bf16.mxu1 %v846_v18  ;;  %v758_v17 = vld [vmem:[#allocation3 + $0x288] sm:$0xff] }
 0x1a7   :  { %1936 = vmatprep.mubr.bf16.mxu0 %v847_v19  ;;  %v762_v18 = vld [vmem:[#allocation3 + $0x2a8] sm:$0xff]  ;;  %v765_v19 = vld [vmem:[#allocation3 + $0x2c0] sm:$0xff]  ;;  %v860_v24 = vpack.c.bf16 %v758_v17, %v755_v15 }
 0x1a8   :  { %v864_v25 = vpack.c.bf16 %v765_v19, %v762_v18  ;;  %v806_v15 = vld [vmem:[#allocation3 + $0x408] sm:$0xff]  ;;  %v813_v18 = vld [vmem:[#allocation3 + $0x440] sm:$0xff] }
 0x1a9   :  { %v810_v17 = vld [vmem:[#allocation3 + $0x428] sm:$0xff] }
 0x1aa   :  { %v888_v20 = vpack.c.bf16 %v813_v18, %v810_v17 }
 0x1ad   :  { %1038 = vmatmul.mubr.bf16.gmra.mrb[32].mxu1 %v845_v28  ;;  %v761_v28 = vld [vmem:[#allocation3 + $0x2a0] sm:$0xff] }
 0x1ae   :  { %1937 = vmatmul.mubr.bf16.gmra.mrb[64].mxu0 %v850_v29  ;;  %1045 = vmatprep.mubr.bf16.mxu1 %v849_v30  ;;  %v764_v29 = vld [vmem:[#allocation3 + $0x2b8] sm:$0xff] }
 0x1af   :  { %1940 = vmatprep.mubr.bf16.mxu0 %v853_v31  ;;  %v768_v30 = vld [vmem:[#allocation3 + $0x2d8] sm:$0xff]  ;;  %v771_v31 = vld [vmem:[#allocation3 + $0x2f0] sm:$0xff]  ;;  %v863_v36 = vpack.c.bf16 %v764_v29, %v761_v28  ;;  %v818_v28 = vld [vmem:[#allocation3 + $0x468] sm:$0xff] }
 0x1b0   :  { %v867_v37 = vpack.c.bf16 %v771_v31, %v768_v30 }
 0x1b5   :  { %1046 = vmatmul.mubr.bf16.gmra.mrb[36].mxu1 %v848_v40  ;;  %v767_v40 = vld [vmem:[#allocation3 + $0x2d0] sm:$0xff] }
 0x1b6   :  { %1053 = vmatprep.mubr.bf16.mxu1 %v852_v41  ;;  %1941 = vmatmul.mubr.bf16.gmra.mrb[68].mxu0 %v856_v42  ;;  %v770_v41 = vld [vmem:[#allocation3 + $0x2e8] sm:$0xff] }
 0x1b7   :  { %1944 = vmatprep.mubr.bf16.mxu0 %v859_v43  ;;  %v774_v42 = vld [vmem:[#allocation3 + $0x308] sm:$0xff]  ;;  %v777_v43 = vld [vmem:[#allocation3 + $0x320] sm:$0xff]  ;;  %v866_v46 = vpack.c.bf16 %v770_v41, %v767_v40 }
 0x1b8   :  { %v870_v47 = vpack.c.bf16 %v777_v43, %v774_v42 }
 0x1bd   :  { %1054 = vmatmul.mubr.bf16.gmra.mrb[40].mxu1 %v851_v50  ;;  %v783_v50 = vld [vmem:[#allocation3 + $0x350] sm:$0xff] }
 0x1be   :  { %1061 = vmatprep.mubr.bf16.mxu1 %v855_v51  ;;  %1945 = vmatmul.mubr.bf16.gmra.mrb[72].mxu0 %v862_v52  ;;  %v869_v51 = vpack.c.bf16 %v776_v8, %v773_v48  ;;  %v873_v52 = vpack.c.bf16 %v783_v50, %v780_v49 }
 0x1bf   :  { %1948 = vmatprep.mubr.bf16.mxu0 %v865_v53  ;;  %v779_v53 = vld [vmem:[#allocation3 + $0x330] sm:$0xff] }
 0x1c0   :  { %v872_v57 = vpack.c.bf16 %v782_v54, %v779_v53 }
 0x1c5   :  { %1062 = vmatmul.mubr.bf16.gmra.mrb[44].mxu1 %v854_v62  ;;  %v795_v62 = vld [vmem:[#allocation3 + $0x3b0] sm:$0xff] }
 0x1c6   :  { %1069 = vmatprep.mubr.bf16.mxu1 %v858_v63  ;;  %1949 = vmatmul.mubr.bf16.gmra.mrb[76].mxu0 %v868_v0  ;;  %v875_v63 = vpack.c.bf16 %v788_v60, %v785_v59  ;;  %v879_v0 = vpack.c.bf16 %v795_v62, %v792_v61 }
 0x1c7   :  { %1952 = vmatprep.mubr.bf16.mxu0 %v871_v1  ;;  %v791_v1 = vld [vmem:[#allocation3 + $0x390] sm:$0xff] }
 0x1c8   :  { %v878_v5 = vpack.c.bf16 %v794_v2, %v791_v1 }
 0x1cd   :  { %1070 = vmatmul.mubr.bf16.gmra.mrb[48].mxu1 %v857_v11  ;;  %v807_v11 = vld [vmem:[#allocation3 + $0x410] sm:$0xff] }
 0x1ce   :  { %1077 = vmatprep.mubr.bf16.mxu1 %v861_v12  ;;  %1953 = vmatmul.mubr.bf16.gmra.mrb[80].mxu0 %v874_v13  ;;  %v881_v12 = vpack.c.bf16 %v800_v9, %v797_v7  ;;  %v885_v13 = vpack.c.bf16 %v807_v11, %v804_v10 }
 0x1cf   :  { %1956 = vmatprep.mubr.bf16.mxu0 %v877_v14  ;;  %v803_v14 = vld [vmem:[#allocation3 + $0x3f0] sm:$0xff] }
 0x1d0   :  { %v884_v19 = vpack.c.bf16 %v806_v15, %v803_v14 }
 0x1d5   :  { %1078 = vmatmul.mubr.bf16.gmra.mrb[52].mxu1 %v860_v24  ;;  %v819_v24 = vld [vmem:[#allocation3 + $0x470] sm:$0xff] }
 0x1d6   :  { %1085 = vmatprep.mubr.bf16.mxu1 %v864_v25  ;;  %1957 = vmatmul.mubr.bf16.gmra.mrb[84].mxu0 %v880_v26  ;;  %v887_v25 = vpack.c.bf16 %v812_v22, %v809_v21  ;;  %v891_v26 = vpack.c.bf16 %v819_v24, %v816_v23 }
 0x1d7   :  { %1960 = vmatprep.mubr.bf16.mxu0 %v883_v27  ;;  %v815_v27 = vld [vmem:[#allocation3 + $0x450] sm:$0xff] }
 0x1d8   :  { %v890_v29 = vpack.c.bf16 %v818_v28, %v815_v27 }
 0x1dd   :  { %1086 = vmatmul.mubr.bf16.gmra.mrb[56].mxu1 %v863_v36 }
 0x1de   :  { %1093 = vmatprep.mubr.bf16.mxu1 %v867_v37  ;;  %1961 = vmatmul.mubr.bf16.gmra.mrb[88].mxu0 %v886_v38 }
 0x1df   :  { %1964 = vmatprep.mubr.bf16.mxu0 %v889_v39 }
 0x1e5   :  { %1094 = vmatmul.mubr.bf16.gmra.mrb[60].mxu1 %v866_v46 }
 0x1e6   :  { %1101 = vmatprep.mubr.bf16.mxu1 %v870_v47  ;;  %1965 = vmatmul.mubr.bf16.gmra.mrb[92].mxu0 %v892_v16 }
 0x1ed   :  { %1102 = vmatmul.mubr.bf16.gmra.mrb[64].mxu1 %v869_v51 }
 0x1ee   :  { %1109 = vmatprep.mubr.bf16.mxu1 %v873_v52 }
 0x1f5   :  { %1110 = vmatmul.mubr.bf16.gmra.mrb[68].mxu1 %v872_v57 }
 0x1f6   :  { %1117 = vmatprep.mubr.bf16.mxu1 %v876_v58 }
 0x1fd   :  { %1118 = vmatmul.mubr.bf16.gmra.mrb[72].mxu1 %v875_v63 }
 0x1fe   :  { %1125 = vmatprep.mubr.bf16.mxu1 %v879_v0 }
 0x205   :  { %1126 = vmatmul.mubr.bf16.gmra.mrb[76].mxu1 %v878_v5 }
 0x206   :  { %1133 = vmatprep.mubr.bf16.mxu1 %v882_v6 }
 0x20d   :  { %1134 = vmatmul.mubr.bf16.gmra.mrb[80].mxu1 %v881_v12 }
 0x20e   :  { %1141 = vmatprep.mubr.bf16.mxu1 %v885_v13 }
 0x215   :  { %1142 = vmatmul.mubr.bf16.gmra.mrb[84].mxu1 %v884_v19 }
 0x216   :  { %1149 = vmatprep.mubr.bf16.mxu1 %v888_v20 }
 0x21d   :  { %1150 = vmatmul.mubr.bf16.gmra.mrb[88].mxu1 %v887_v25 }
 0x21e   :  { %1157 = vmatprep.mubr.bf16.mxu1 %v891_v26 }
 0x225   :  { %1158 = vmatmul.mubr.bf16.gmra.mrb[92].mxu1 %v890_v29 }
 0x240   :  { %v975_v30 = vpop.f32.mrb[0].mxu1 }
 0x241   :  { %v977_v31 = vpop.f32.mrb[1].mxu1 }
 0x242   :  { %v978_v32 = vpop.f32.mrb[2].mxu1 }
 0x243   :  { %v980_v33 = vpop.f32.mrb[3].mxu1 }
 0x248   :  { %v983_v34 = vpop.f32.mrb[4].mxu1 }
 0x249   :  { %v985_v35 = vpop.f32.mrb[5].mxu1 }
 0x24a   :  { %v986_v36 = vpop.f32.mrb[6].mxu1 }
 0x24b   :  { %v988_v37 = vpop.f32.mrb[7].mxu1 }
 0x250   :  { %v991_v38 = vpop.f32.mrb[8].mxu1 }
 0x251   :  { %v993_v39 = vpop.f32.mrb[9].mxu1 }
 0x252   :  { %v994_v40 = vpop.f32.mrb[10].mxu1 }
 0x253   :  { %v996_v41 = vpop.f32.mrb[11].mxu1 }
 0x258   :  { %v999_v42 = vpop.f32.mrb[12].mxu1 }
 0x259   :  { %v1001_v43 = vpop.f32.mrb[13].mxu1 }
 0x25a   :  { %v1002_v44 = vpop.f32.mrb[14].mxu1 }
 0x25b   :  { %v1004_v45 = vpop.f32.mrb[15].mxu1 }
 0x260   :  { %v1007_v46 = vpop.f32.mrb[16].mxu1 }
 0x261   :  { %v1009_v47 = vpop.f32.mrb[17].mxu1  ;;  %v1922_v16 = vpop.f32.mrb[48].mxu0 }
 0x262   :  { %v1209_v48 = vadd.f32 %v1922_v16, %v983_v34  ;;  %v1010_v8 = vpop.f32.mrb[18].mxu1  ;;  %v1200_v49 = vpop.f32.mrb[49].mxu0 }
 0x263   :  { %v1201_v50 = vadd.f32 %v1200_v49, %v975_v30  ;;  %v1012_v51 = vpop.f32.mrb[19].mxu1  ;;  %v1923_v52 = vpop.f32.mrb[50].mxu0 }
 0x264   :  { %v1540_v53 = vmax.f32 %v1209_v48, 0.0  ;;  %v1212_v54 = vadd.f32 %v1923_v52, %v986_v36  ;;  %v1203_v55 = vpop.f32.mrb[51].mxu0 }
 0x265   :  { %v1538_v56 = vmax.f32 %v1201_v50, 0.0  ;;  %v1204_v57 = vadd.f32 %v1203_v55, %v978_v32 }
 0x266   :  { %1588 = vst [vmem:[%s2613_s4 + $0x10] sm:$0xff] %v1540_v53  ;;  %v1541_v58 = vmax.f32 %v1212_v54, 0.0 }
 0x267   :  { %1586 = vst [vmem:[%s2613_s4] sm:$0xff] %v1538_v56  ;;  %v1539_v59 = vmax.f32 %v1204_v57, 0.0 }
 0x268   :  { %1589 = vst [vmem:[%s2613_s4 + $0x18] sm:$0xff] %v1541_v58  ;;  %v1015_v60 = vpop.f32.mrb[20].mxu1 }
 0x269   :  { %1587 = vst [vmem:[%s2613_s4 + $0x8] sm:$0xff] %v1539_v59  ;;  %v1017_v61 = vpop.f32.mrb[21].mxu1  ;;  %v1926_v62 = vpop.f32.mrb[52].mxu0 }
 0x26a   :  { %v1225_v63 = vadd.f32 %v1926_v62, %v999_v42  ;;  %v1018_v0 = vpop.f32.mrb[22].mxu1  ;;  %v1216_v1 = vpop.f32.mrb[53].mxu0 }
 0x26b   :  { %v1217_v2 = vadd.f32 %v1216_v1, %v991_v38  ;;  %v1020_v3 = vpop.f32.mrb[23].mxu1  ;;  %v1927_v4 = vpop.f32.mrb[54].mxu0 }
 0x26c   :  { %v1544_v5 = vmax.f32 %v1225_v63, 0.0  ;;  %v1228_v6 = vadd.f32 %v1927_v4, %v1002_v44  ;;  %v1219_v7 = vpop.f32.mrb[55].mxu0 }
 0x26d   :  { %v1542_v9 = vmax.f32 %v1217_v2, 0.0  ;;  %v1220_v10 = vadd.f32 %v1219_v7, %v994_v40 }
 0x26e   :  { %1592 = vst [vmem:[%s2613_s4 + $0x30] sm:$0xff] %v1544_v5  ;;  %v1545_v11 = vmax.f32 %v1228_v6, 0.0 }
 0x26f   :  { %1590 = vst [vmem:[%s2613_s4 + $0x20] sm:$0xff] %v1542_v9  ;;  %v1543_v12 = vmax.f32 %v1220_v10, 0.0 }
 0x270   :  { %1593 = vst [vmem:[%s2613_s4 + $0x38] sm:$0xff] %v1545_v11  ;;  %v1023_v13 = vpop.f32.mrb[24].mxu1 }
 0x271   :  { %1591 = vst [vmem:[%s2613_s4 + $0x28] sm:$0xff] %v1543_v12  ;;  %v1025_v14 = vpop.f32.mrb[25].mxu1  ;;  %v1930_v15 = vpop.f32.mrb[56].mxu0 }
 0x272   :  { %v1241_v17 = vadd.f32 %v1930_v15, %v1015_v60  ;;  %v1026_v18 = vpop.f32.mrb[26].mxu1  ;;  %v1232_v19 = vpop.f32.mrb[57].mxu0 }
 0x273   :  { %v1233_v20 = vadd.f32 %v1232_v19, %v1007_v46  ;;  %v1028_v21 = vpop.f32.mrb[27].mxu1  ;;  %v1931_v22 = vpop.f32.mrb[58].mxu0 }
 0x274   :  { %v1548_v23 = vmax.f32 %v1241_v17, 0.0  ;;  %v1244_v24 = vadd.f32 %v1931_v22, %v1018_v0  ;;  %v1235_v25 = vpop.f32.mrb[59].mxu0 }
 0x275   :  { %v1546_v26 = vmax.f32 %v1233_v20, 0.0  ;;  %v1236_v27 = vadd.f32 %v1235_v25, %v1010_v8 }
 0x276   :  { %1596 = vst [vmem:[%s2613_s4 + $0x50] sm:$0xff] %v1548_v23  ;;  %v1549_v28 = vmax.f32 %v1244_v24, 0.0 }
 0x277   :  { %1594 = vst [vmem:[%s2613_s4 + $0x40] sm:$0xff] %v1546_v26  ;;  %v1547_v29 = vmax.f32 %v1236_v27, 0.0 }
 0x278   :  { %1597 = vst [vmem:[%s2613_s4 + $0x58] sm:$0xff] %v1549_v28  ;;  %v1031_v30 = vpop.f32.mrb[28].mxu1 }
 0x279   :  { %1595 = vst [vmem:[%s2613_s4 + $0x48] sm:$0xff] %v1547_v29  ;;  %v1033_v31 = vpop.f32.mrb[29].mxu1  ;;  %v1934_v32 = vpop.f32.mrb[60].mxu0 }
 0x27a   :  { %v1257_v33 = vadd.f32 %v1934_v32, %v1031_v30  ;;  %v1034_v34 = vpop.f32.mrb[30].mxu1  ;;  %v1248_v35 = vpop.f32.mrb[61].mxu0 }
 0x27b   :  { %v1249_v36 = vadd.f32 %v1248_v35, %v1023_v13  ;;  %v1036_v37 = vpop.f32.mrb[31].mxu1  ;;  %v1935_v38 = vpop.f32.mrb[62].mxu0 }
 0x27c   :  { %v1552_v39 = vmax.f32 %v1257_v33, 0.0  ;;  %v1260_v40 = vadd.f32 %v1935_v38, %v1034_v34  ;;  %v1251_v41 = vpop.f32.mrb[63].mxu0 }
 0x27d   :  { %v1550_v42 = vmax.f32 %v1249_v36, 0.0  ;;  %v1252_v43 = vadd.f32 %v1251_v41, %v1026_v18 }
 0x27e   :  { %1600 = vst [vmem:[%s2613_s4 + $0x70] sm:$0xff] %v1552_v39  ;;  %v1553_v44 = vmax.f32 %v1260_v40, 0.0 }
 0x27f   :  { %1598 = vst [vmem:[%s2613_s4 + $0x60] sm:$0xff] %v1550_v42  ;;  %v1551_v45 = vmax.f32 %v1252_v43, 0.0 }
 0x280   :  { %1601 = vst [vmem:[%s2613_s4 + $0x78] sm:$0xff] %v1553_v44  ;;  %v1039_v46 = vpop.f32.mrb[32].mxu1 }
 0x281   :  { %1599 = vst [vmem:[%s2613_s4 + $0x68] sm:$0xff] %v1551_v45  ;;  %v1041_v47 = vpop.f32.mrb[33].mxu1  ;;  %v1938_v16 = vpop.f32.mrb[64].mxu0 }
 0x282   :  { %v1042_v48 = vpop.f32.mrb[34].mxu1  ;;  %v1264_v8 = vpop.f32.mrb[65].mxu0 }
 0x283   :  { %v1265_v49 = vadd.f32 %v1264_v8, %v1039_v46  ;;  %v1044_v50 = vpop.f32.mrb[35].mxu1  ;;  %v1939_v51 = vpop.f32.mrb[66].mxu0 }
 0x284   :  { %v1267_v52 = vpop.f32.mrb[67].mxu0 }
 0x285   :  { %v1554_v53 = vmax.f32 %v1265_v49, 0.0  ;;  %v1268_v54 = vadd.f32 %v1267_v52, %v1042_v48 }
 0x287   :  { %1602 = vst [vmem:[%s2613_s4 + $0x80] sm:$0xff] %v1554_v53  ;;  %v1555_v55 = vmax.f32 %v1268_v54, 0.0 }
 0x288   :  { %v1047_v56 = vpop.f32.mrb[36].mxu1 }
 0x289   :  { %1603 = vst [vmem:[%s2613_s4 + $0x88] sm:$0xff] %v1555_v55  ;;  %v1273_v57 = vadd.f32 %v1938_v16, %v1047_v56  ;;  %v1049_v58 = vpop.f32.mrb[37].mxu1  ;;  %v1942_v59 = vpop.f32.mrb[68].mxu0 }
 0x28a   :  { %v1050_v60 = vpop.f32.mrb[38].mxu1  ;;  %v1280_v61 = vpop.f32.mrb[69].mxu0 }
 0x28b   :  { %v1556_v62 = vmax.f32 %v1273_v57, 0.0  ;;  %v1276_v63 = vadd.f32 %v1939_v51, %v1050_v60  ;;  %v1052_v0 = vpop.f32.mrb[39].mxu1  ;;  %v1943_v1 = vpop.f32.mrb[70].mxu0 }
 0x28c   :  { %v1283_v2 = vpop.f32.mrb[71].mxu0 }
 0x28d   :  { %1604 = vst [vmem:[%s2613_s4 + $0x90] sm:$0xff] %v1556_v62  ;;  %v1557_v3 = vmax.f32 %v1276_v63, 0.0 }
 0x28f   :  { %1605 = vst [vmem:[%s2613_s4 + $0x98] sm:$0xff] %v1557_v3 }
 0x290   :  { %v1055_v4 = vpop.f32.mrb[40].mxu1 }
 0x291   :  { %v1057_v5 = vpop.f32.mrb[41].mxu1  ;;  %v1281_v6 = vadd.f32 %v1280_v61, %v1055_v4  ;;  %v1946_v7 = vpop.f32.mrb[72].mxu0 }
 0x292   :  { %v1058_v9 = vpop.f32.mrb[42].mxu1  ;;  %v1296_v10 = vpop.f32.mrb[73].mxu0 }
 0x293   :  { %v1558_v11 = vmax.f32 %v1281_v6, 0.0  ;;  %v1060_v12 = vpop.f32.mrb[43].mxu1  ;;  %v1284_v13 = vadd.f32 %v1283_v2, %v1058_v9  ;;  %v1947_v14 = vpop.f32.mrb[74].mxu0 }
 0x294   :  { %v1299_v15 = vpop.f32.mrb[75].mxu0 }
 0x295   :  { %1606 = vst [vmem:[%s2613_s4 + $0xa0] sm:$0xff] %v1558_v11  ;;  %v1559_v17 = vmax.f32 %v1284_v13, 0.0 }
 0x297   :  { %1607 = vst [vmem:[%s2613_s4 + $0xa8] sm:$0xff] %v1559_v17 }
 0x298   :  { %v1063_v18 = vpop.f32.mrb[44].mxu1 }
 0x299   :  { %v1289_v19 = vadd.f32 %v1942_v59, %v1063_v18  ;;  %v1065_v20 = vpop.f32.mrb[45].mxu1  ;;  %v1950_v21 = vpop.f32.mrb[76].mxu0 }
 0x29a   :  { %v1066_v22 = vpop.f32.mrb[46].mxu1  ;;  %v1312_v23 = vpop.f32.mrb[77].mxu0 }
 0x29b   :  { %v1560_v24 = vmax.f32 %v1289_v19, 0.0  ;;  %v1292_v25 = vadd.f32 %v1943_v1, %v1066_v22  ;;  %v1068_v26 = vpop.f32.mrb[47].mxu1  ;;  %v1951_v27 = vpop.f32.mrb[78].mxu0 }
 0x29c   :  { %v1315_v28 = vpop.f32.mrb[79].mxu0 }
 0x29d   :  { %1608 = vst [vmem:[%s2613_s4 + $0xb0] sm:$0xff] %v1560_v24  ;;  %v1561_v29 = vmax.f32 %v1292_v25, 0.0 }
 0x29f   :  { %1609 = vst [vmem:[%s2613_s4 + $0xb8] sm:$0xff] %v1561_v29 }
 0x2a0   :  { %v1071_v30 = vpop.f32.mrb[48].mxu1 }
 0x2a1   :  { %v1073_v31 = vpop.f32.mrb[49].mxu1  ;;  %v1297_v32 = vadd.f32 %v1296_v10, %v1071_v30  ;;  %v2504_v33 = vpop.f32.mrb[80].mxu0 }
 0x2a2   :  { %v1074_v34 = vpop.f32.mrb[50].mxu1  ;;  %v1328_v35 = vpop.f32.mrb[81].mxu0 }
 0x2a3   :  { %v1562_v36 = vmax.f32 %v1297_v32, 0.0  ;;  %v1076_v37 = vpop.f32.mrb[51].mxu1  ;;  %v1300_v38 = vadd.f32 %v1299_v15, %v1074_v34  ;;  %v1955_v39 = vpop.f32.mrb[82].mxu0 }
 0x2a4   :  { %v1331_v40 = vpop.f32.mrb[83].mxu0 }
 0x2a5   :  { %1610 = vst [vmem:[%s2613_s4 + $0xc0] sm:$0xff] %v1562_v36  ;;  %v1563_v41 = vmax.f32 %v1300_v38, 0.0 }
 0x2a7   :  { %1611 = vst [vmem:[%s2613_s4 + $0xc8] sm:$0xff] %v1563_v41 }
 0x2a8   :  { %v1079_v42 = vpop.f32.mrb[52].mxu1 }
 0x2a9   :  { %v1305_v43 = vadd.f32 %v1946_v7, %v1079_v42  ;;  %v1081_v44 = vpop.f32.mrb[53].mxu1  ;;  %v2512_v45 = vpop.f32.mrb[84].mxu0 }
 0x2aa   :  { %v1082_v46 = vpop.f32.mrb[54].mxu1  ;;  %v1344_v47 = vpop.f32.mrb[85].mxu0 }
 0x2ab   :  { %v1564_v16 = vmax.f32 %v1305_v43, 0.0  ;;  %v1308_v48 = vadd.f32 %v1947_v14, %v1082_v46  ;;  %v1084_v8 = vpop.f32.mrb[55].mxu1  ;;  %v2514_v49 = vpop.f32.mrb[86].mxu0 }
 0x2ac   :  { %v1347_v50 = vpop.f32.mrb[87].mxu0 }
 0x2ad   :  { %1612 = vst [vmem:[%s2613_s4 + $0xd0] sm:$0xff] %v1564_v16  ;;  %v1565_v51 = vmax.f32 %v1308_v48, 0.0 }
 0x2af   :  { %1613 = vst [vmem:[%s2613_s4 + $0xd8] sm:$0xff] %v1565_v51 }
 0x2b0   :  { %v1087_v52 = vpop.f32.mrb[56].mxu1 }
 0x2b1   :  { %v1089_v53 = vpop.f32.mrb[57].mxu1  ;;  %v1313_v54 = vadd.f32 %v1312_v23, %v1087_v52  ;;  %v2522_v55 = vpop.f32.mrb[88].mxu0 }
 0x2b2   :  { %v1090_v56 = vpop.f32.mrb[58].mxu1  ;;  %v2524_v57 = vpop.f32.mrb[89].mxu0 }
 0x2b3   :  { %v1566_v58 = vmax.f32 %v1313_v54, 0.0  ;;  %v1092_v59 = vpop.f32.mrb[59].mxu1  ;;  %v1316_v60 = vadd.f32 %v1315_v28, %v1090_v56  ;;  %v2526_v61 = vpop.f32.mrb[90].mxu0 }
 0x2b4   :  { %v2528_v62 = vpop.f32.mrb[91].mxu0 }
 0x2b5   :  { %1614 = vst [vmem:[%s2613_s4 + $0xe0] sm:$0xff] %v1566_v58  ;;  %v1567_v63 = vmax.f32 %v1316_v60, 0.0 }
 0x2b7   :  { %1615 = vst [vmem:[%s2613_s4 + $0xe8] sm:$0xff] %v1567_v63 }
 0x2b8   :  { %v1095_v0 = vpop.f32.mrb[60].mxu1 }
 0x2b9   :  { %v1321_v1 = vadd.f32 %v1950_v21, %v1095_v0  ;;  %v1097_v2 = vpop.f32.mrb[61].mxu1  ;;  %v2536_v3 = vpop.f32.mrb[92].mxu0 }
 0x2ba   :  { %v1098_v4 = vpop.f32.mrb[62].mxu1  ;;  %v2538_v5 = vpop.f32.mrb[93].mxu0 }
 0x2bb   :  { %v1568_v6 = vmax.f32 %v1321_v1, 0.0  ;;  %v1324_v7 = vadd.f32 %v1951_v27, %v1098_v4  ;;  %v1100_v9 = vpop.f32.mrb[63].mxu1  ;;  %v2540_v10 = vpop.f32.mrb[94].mxu0 }
 0x2bc   :  { %v2542_v11 = vpop.f32.mrb[95].mxu0 }
 0x2bd   :  { %1616 = vst [vmem:[%s2613_s4 + $0xf0] sm:$0xff] %v1568_v6  ;;  %v1569_v12 = vmax.f32 %v1324_v7, 0.0 }
 0x2bf   :  { %1617 = vst [vmem:[%s2613_s4 + $0xf8] sm:$0xff] %v1569_v12 }
 0x2c0   :  { %v1103_v13 = vpop.f32.mrb[64].mxu1 }
 0x2c1   :  { %v1105_v14 = vpop.f32.mrb[65].mxu1  ;;  %v1329_v15 = vadd.f32 %v1328_v35, %v1103_v13 }
 0x2c2   :  { %v1106_v17 = vpop.f32.mrb[66].mxu1 }
 0x2c3   :  { %v1570_v18 = vmax.f32 %v1329_v15, 0.0  ;;  %v1108_v19 = vpop.f32.mrb[67].mxu1  ;;  %v1332_v20 = vadd.f32 %v1331_v40, %v1106_v17 }
 0x2c5   :  { %1618 = vst [vmem:[%s2613_s4 + $0x100] sm:$0xff] %v1570_v18  ;;  %v1571_v21 = vmax.f32 %v1332_v20, 0.0 }
 0x2c7   :  { %1619 = vst [vmem:[%s2613_s4 + $0x108] sm:$0xff] %v1571_v21 }
 0x2c8   :  { %v1111_v22 = vpop.f32.mrb[68].mxu1 }
 0x2c9   :  { %v1337_v23 = vadd.f32 %v2504_v33, %v1111_v22  ;;  %v1113_v24 = vpop.f32.mrb[69].mxu1 }
 0x2ca   :  { %v1114_v25 = vpop.f32.mrb[70].mxu1 }
 0x2cb   :  { %v1572_v26 = vmax.f32 %v1337_v23, 0.0  ;;  %v1340_v27 = vadd.f32 %v1955_v39, %v1114_v25  ;;  %v1116_v28 = vpop.f32.mrb[71].mxu1 }
 0x2cd   :  { %1620 = vst [vmem:[%s2613_s4 + $0x110] sm:$0xff] %v1572_v26  ;;  %v1573_v29 = vmax.f32 %v1340_v27, 0.0 }
 0x2cf   :  { %1621 = vst [vmem:[%s2613_s4 + $0x118] sm:$0xff] %v1573_v29 }
 0x2d0   :  { %v1119_v30 = vpop.f32.mrb[72].mxu1 }
 0x2d1   :  { %v1121_v31 = vpop.f32.mrb[73].mxu1  ;;  %v1345_v32 = vadd.f32 %v1344_v47, %v1119_v30 }
 0x2d2   :  { %v1122_v34 = vpop.f32.mrb[74].mxu1 }
 0x2d3   :  { %v1574_v35 = vmax.f32 %v1345_v32, 0.0  ;;  %v1124_v33 = vpop.f32.mrb[75].mxu1  ;;  %v1348_v36 = vadd.f32 %v1347_v50, %v1122_v34 }
 0x2d5   :  { %1622 = vst [vmem:[%s2613_s4 + $0x120] sm:$0xff] %v1574_v35  ;;  %v1575_v37 = vmax.f32 %v1348_v36, 0.0 }
 0x2d7   :  { %1623 = vst [vmem:[%s2613_s4 + $0x128] sm:$0xff] %v1575_v37 }
 0x2d8   :  { %v1127_v38 = vpop.f32.mrb[76].mxu1 }
 0x2d9   :  { %v1353_v39 = vadd.f32 %v2512_v45, %v1127_v38  ;;  %v1129_v40 = vpop.f32.mrb[77].mxu1 }
 0x2da   :  { %v1130_v41 = vpop.f32.mrb[78].mxu1 }
 0x2db   :  { %v1576_v42 = vmax.f32 %v1353_v39, 0.0  ;;  %v1356_v43 = vadd.f32 %v2514_v49, %v1130_v41  ;;  %v1132_v44 = vpop.f32.mrb[79].mxu1 }
 0x2dd   :  { %1624 = vst [vmem:[%s2613_s4 + $0x130] sm:$0xff] %v1576_v42  ;;  %v1577_v46 = vmax.f32 %v1356_v43, 0.0 }
 0x2df   :  { %1625 = vst [vmem:[%s2613_s4 + $0x138] sm:$0xff] %v1577_v46 }
 0x2e0   :  { %v1135_v47 = vpop.f32.mrb[80].mxu1 }
 0x2e1   :  { %v1137_v16 = vpop.f32.mrb[81].mxu1  ;;  %v1361_v48 = vadd.f32 %v2524_v57, %v1135_v47 }
 0x2e2   :  { %v1138_v45 = vpop.f32.mrb[82].mxu1 }
 0x2e3   :  { %v1578_v8 = vmax.f32 %v1361_v48, 0.0  ;;  %v1140_v50 = vpop.f32.mrb[83].mxu1  ;;  %v1364_v51 = vadd.f32 %v2528_v62, %v1138_v45 }
 0x2e5   :  { %1626 = vst [vmem:[%s2613_s4 + $0x140] sm:$0xff] %v1578_v8  ;;  %v1579_v49 = vmax.f32 %v1364_v51, 0.0 }
 0x2e7   :  { %1627 = vst [vmem:[%s2613_s4 + $0x148] sm:$0xff] %v1579_v49 }
 0x2e8   :  { %v1143_v52 = vpop.f32.mrb[84].mxu1 }
 0x2e9   :  { %v1369_v53 = vadd.f32 %v2522_v55, %v1143_v52  ;;  %v1145_v54 = vpop.f32.mrb[85].mxu1 }
 0x2ea   :  { %v1146_v56 = vpop.f32.mrb[86].mxu1 }
 0x2eb   :  { %v1580_v57 = vmax.f32 %v1369_v53, 0.0  ;;  %v1372_v58 = vadd.f32 %v2526_v61, %v1146_v56  ;;  %v1148_v59 = vpop.f32.mrb[87].mxu1 }
 0x2ed   :  { %1628 = vst [vmem:[%s2613_s4 + $0x150] sm:$0xff] %v1580_v57  ;;  %v1581_v60 = vmax.f32 %v1372_v58, 0.0 }
 0x2ef   :  { %1629 = vst [vmem:[%s2613_s4 + $0x158] sm:$0xff] %v1581_v60 }
 0x2f0   :  { %v1151_v62 = vpop.f32.mrb[88].mxu1 }
 0x2f1   :  { %v1153_v63 = vpop.f32.mrb[89].mxu1  ;;  %v1377_v0 = vadd.f32 %v2538_v5, %v1151_v62 }
 0x2f2   :  { %v1154_v55 = vpop.f32.mrb[90].mxu1 }
 0x2f3   :  { %v1582_v1 = vmax.f32 %v1377_v0, 0.0  ;;  %v1156_v2 = vpop.f32.mrb[91].mxu1  ;;  %v1380_v4 = vadd.f32 %v2542_v11, %v1154_v55 }
 0x2f5   :  { %1630 = vst [vmem:[%s2613_s4 + $0x160] sm:$0xff] %v1582_v1  ;;  %v1583_v61 = vmax.f32 %v1380_v4, 0.0 }
 0x2f7   :  { %1631 = vst [vmem:[%s2613_s4 + $0x168] sm:$0xff] %v1583_v61 }
 0x2f8   :  { %v1159_v6 = vpop.f32.mrb[92].mxu1 }
 0x2f9   :  { %v1385_v7 = vadd.f32 %v2536_v3, %v1159_v6  ;;  %v1161_v9 = vpop.f32.mrb[93].mxu1 }
 0x2fa   :  { %v1162_v12 = vpop.f32.mrb[94].mxu1 }
 0x2fb   :  { %v1584_v5 = vmax.f32 %v1385_v7, 0.0  ;;  %v1388_v13 = vadd.f32 %v2540_v10, %v1162_v12  ;;  %v1164_v14 = vpop.f32.mrb[95].mxu1 }
 0x2fd   :  { %1632 = vst [vmem:[%s2613_s4 + $0x170] sm:$0xff] %v1584_v5  ;;  %v1585_v11 = vmax.f32 %v1388_v13, 0.0 }
 0x2ff   :  { %1633 = vst [vmem:[%s2613_s4 + $0x178] sm:$0xff] %v1585_v11 }
 0x300   :  { %1638 = vsyncpa [#allocation4], 1 }

</bundles_post_ra>
